<compile_context>
chip_gen: v5e
topology: v5e:2x2
jax: 0.10.0
libtpu: 0.0.40
codegen_flags: <defaults>
</compile_context>

<pallas_src>
import jax
import jax.numpy as jnp
from jax.experimental import pallas as pl
from jax.experimental.pallas import tpu as pltpu

LANES = 128                 # all channel dims padded to a lane-dense 128
GRID_HW = 8                 # layer-1 output grid (8x8); layers 2/3 stay on this padded grid
GRID_M = GRID_HW * GRID_HW  # 64 flat rows per image
SCR_ROWS = 96               # >= GRID_M + max tap shift (18), multiple of 8
NEG_SLOPE = 0.2

LAYER_CFG = [(3, 2, 1), (3, 1, 0), (2, 1, 0)]   # (kernel, stride, padding)


def _leaky(x):
    return jnp.where(x >= 0.0, x, NEG_SLOPE * x)


# ----------------------------- Pallas kernel -----------------------------

def _fused_encoder_kernel(x_ref, w1_ref, b1_ref, w2_ref, b2_ref,
                          w3_ref, b3_ref, o_ref, a1_scr, a2_scr):
    # x_ref : (1, 64, K1P) bf16  layer-1 im2col patches, 9 stride-2 taps packed along K
    # w1_ref: (K1P, 128)   bf16  layer-1 packed weight (K1P = pad(9*Cin, 128))
    # w2_ref: (9, 128, 128) bf16 per-tap weights, in/out channels zero-padded to 128
    # w3_ref: (4, 128, 128) bf16
    # bN_ref: (1, 128) f32
    # o_ref : (1, 64, 128) f32   padded 8x8 output grid (valid 5x5 cropped outside)
    # aN_scr: (96, 128) f32      VMEM-resident inter-layer activations

    # ---- layer 1: 3x3 stride-2 conv = one K-packed GEMM ----
    acc = jnp.dot(x_ref[0], w1_ref[...], preferred_element_type=jnp.float32)
    a1 = _leaky(acc + b1_ref[...])                       # (64,128), valid 8x8 grid
    a1_bf = a1.astype(jnp.bfloat16)

    # stash in VMEM; zero the tail so shifted reads past row 63 stay defined
    a1_scr[GRID_M:, :] = jnp.zeros((SCR_ROWS - GRID_M, LANES), jnp.float32)
    a1_scr[:GRID_M, :] = a1

    # ---- layer 2: 3x3 valid conv on the 8x8 grid via row-shifted GEMMs ----
    # out[h*8+w] = sum_{i,j} a1[(h+i)*8+(w+j)] @ W2[i,j]  (shift s = i*8+j)
    acc = jnp.dot(a1_bf, w2_ref[0], preferred_element_type=jnp.float32)
    for i in range(3):
        for j in range(3):
            if i == 0 and j == 0:
                continue
            s = i * GRID_HW + j
            src = a1_scr[pl.ds(s, GRID_M), :].astype(jnp.bfloat16)
            acc = acc + jnp.dot(src, w2_ref[i * 3 + j],
                                preferred_element_type=jnp.float32)
    a2 = _leaky(acc + b2_ref[...])                       # valid rows: h,w in [0,6)
    a2_bf = a2.astype(jnp.bfloat16)

    a2_scr[GRID_M:, :] = jnp.zeros((SCR_ROWS - GRID_M, LANES), jnp.float32)
    a2_scr[:GRID_M, :] = a2

    # ---- layer 3: 2x2 valid conv, same shifted-GEMM scheme ----
    acc = jnp.dot(a2_bf, w3_ref[0], preferred_element_type=jnp.float32)
    for i in range(2):
        for j in range(2):
            if i == 0 and j == 0:
                continue
            s = i * GRID_HW + j
            src = a2_scr[pl.ds(s, GRID_M), :].astype(jnp.bfloat16)
            acc = acc + jnp.dot(src, w3_ref[i * 2 + j],
                                preferred_element_type=jnp.float32)
    o_ref[0] = _leaky(acc + b3_ref[...])                 # valid rows: h,w in [0,5)


# ------------------------------ JAX glue ---------------------------------

def _prepare_inputs(x_nchw, params):
    """Layout plumbing: NHWC, layer-1 K-packed im2col, lane-padded weight packing."""
    N, C, H, W = x_nchw.shape
    (w1, b1), (w2, b2), (w3, b3) = params

    x = jnp.transpose(x_nchw, (0, 2, 3, 1))                       # NHWC
    x = jnp.pad(x, ((0, 0), (1, 1), (1, 1), (0, 0)))              # spatial pad=1

    # layer-1 im2col, taps packed along K: (N, 64, 9*C) -> pad K to a 128 multiple
    taps = []
    for i in range(3):
        for j in range(3):
            t = x[:, i:i + 2 * GRID_HW:2, j:j + 2 * GRID_HW:2, :]  # (N,8,8,C)
            taps.append(t.reshape(N, GRID_M, C))
    patches = jnp.concatenate(taps, axis=-1)                      # (N,64,9*C)
    K1 = 9 * C
    K1P = ((K1 + LANES - 1) // LANES) * LANES
    patches = jnp.pad(patches, ((0, 0), (0, 0), (0, K1P - K1))).astype(jnp.bfloat16)

    # layer-1 weight: (OC,IC,KH,KW) -> (KH*KW*IC, OC) -> zero-pad to (K1P, 128)
    OC1 = w1.shape[0]
    w1m = jnp.transpose(w1, (2, 3, 1, 0)).reshape(K1, OC1)
    w1m = jnp.pad(w1m, ((0, K1P - K1), (0, LANES - OC1))).astype(jnp.bfloat16)

    def pack_w(w):  # (OC, IC, KH, KW) -> (KH*KW, 128, 128) bf16, zero-padded
        OC, IC, KH, KW = w.shape
        wm = jnp.transpose(w, (2, 3, 1, 0)).reshape(KH * KW, IC, OC)
        wm = jnp.pad(wm, ((0, 0), (0, LANES - IC), (0, LANES - OC)))
        return wm.astype(jnp.bfloat16)

    def pack_b(b):
        return jnp.pad(b, (0, LANES - b.shape[0])).reshape(1, LANES).astype(jnp.float32)

    return (patches, w1m, pack_b(b1), pack_w(w2), pack_b(b2),
            pack_w(w3), pack_b(b3))


@jax.jit
def end_encoder_forward(x_nchw, params):
    N = x_nchw.shape[0]
    patches, w1, b1, w2, b2, w3, b3 = _prepare_inputs(x_nchw, params)
    K1P = patches.shape[-1]

    out = pl.pallas_call(
        _fused_encoder_kernel,
        out_shape=jax.ShapeDtypeStruct((N, GRID_M, LANES), jnp.float32),
        grid=(N,),
        in_specs=[
            pl.BlockSpec((1, GRID_M, K1P), lambda n: (n, 0, 0)),
            pl.BlockSpec((K1P, LANES), lambda n: (0, 0)),
            pl.BlockSpec((1, LANES), lambda n: (0, 0)),
            pl.BlockSpec((9, LANES, LANES), lambda n: (0, 0, 0)),
            pl.BlockSpec((1, LANES), lambda n: (0, 0)),
            pl.BlockSpec((4, LANES, LANES), lambda n: (0, 0, 0)),
            pl.BlockSpec((1, LANES), lambda n: (0, 0)),
        ],
        out_specs=pl.BlockSpec((1, GRID_M, LANES), lambda n: (n, 0, 0)),
        scratch_shapes=[
            pltpu.VMEM((SCR_ROWS, LANES), jnp.float32),
            pltpu.VMEM((SCR_ROWS, LANES), jnp.float32),
        ],
        compiler_params=pltpu.CompilerParams(
            dimension_semantics=("parallel",)),
    )(patches, w1, b1, w2, b2, w3, b3)

    # crop valid 5x5 region off the padded 8x8 grid, go back to NCHW once
    out = out.reshape(N, GRID_HW, GRID_HW, LANES)[:, :5, :5, :]
    return jnp.transpose(out, (0, 3, 1, 2))                        # (N, 128, 5, 5)


# ----------------------- params / reference / main ------------------------

def spectral_normalize(w, key, n_iters=1, eps=1e-12):
    """Divide conv weight (OC, C, KH, KW) by its spectral norm (power iteration).
    # TODO(synk): torch.spectral_norm keeps a persistent u buffer across calls;
    # here a fresh 1-step power iteration is used as parameter preprocessing."""
    OC = w.shape[0]
    w_mat = w.reshape(OC, -1)
    u = jax.random.normal(key, (OC,), dtype=w.dtype)
    u = u / (jnp.linalg.norm(u) + eps)
    v = None
    for _ in range(n_iters):
        v = w_mat.T @ u
        v = v / (jnp.linalg.norm(v) + eps)
        u = w_mat @ v
        u = u / (jnp.linalg.norm(u) + eps)
    sigma = u @ (w_mat @ v)
    return w / sigma


def init_params(key, in_channels=40):
    channel_list = [in_channels, 32, 64, 128]
    kernel_list = [3, 3, 2]
    params = []
    for layer_no in range(3):
        cin, cout, k = channel_list[layer_no], channel_list[layer_no + 1], kernel_list[layer_no]
        key, kw_, kb_, ku_ = jax.random.split(key, 4)
        fan_in = cin * k * k
        bound = 1.0 / jnp.sqrt(fan_in)
        w = jax.random.uniform(kw_, (cout, cin, k, k), jnp.float32, -bound, bound)
        b = jax.random.uniform(kb_, (cout,), jnp.float32, -bound, bound)
        w = spectral_normalize(w, ku_, n_iters=1)
        params.append((w, b))
    return params


def reference_forward(x, params):
    """Pure-JAX f32 reference (lax conv) for correctness checking."""
    y = x
    for (w, b), (k, s, p) in zip(params, LAYER_CFG):
        y = jax.lax.conv_general_dilated(
            y, w, window_strides=(s, s), padding=[(p, p), (p, p)],
            dimension_numbers=("NCHW", "OIHW", "NCHW"))
        y = y + b.reshape(1, -1, 1, 1)
        y = jnp.where(y >= 0.0, y, NEG_SLOPE * y)
    return y


if __name__ == "__main__":
    key = jax.random.PRNGKey(0)
    k_x, k_p = jax.random.split(key)

    in_channels = 40
    x = jax.random.normal(k_x, (2, in_channels, 16, 16), dtype=jnp.float32)
    params = init_params(k_p, in_channels=in_channels)

    out = end_encoder_forward(x, params)
    out = jax.block_until_ready(out)

    # 16 ->(k3,s2,p1) 8 ->(k3,s1,p0) 6 ->(k2,s1,p0) 5
    assert out.shape == (2, 128, 5, 5), out.shape
    assert bool(jnp.all(jnp.isfinite(out)))

    ref = reference_forward(x, params)
    max_err = float(jnp.max(jnp.abs(out - ref)))
    assert max_err < 0.1, f"max abs err vs f32 reference: {max_err}"

    print("KERNEL_OK")
</pallas_src>

<mosaic_0001>
module attributes {stable_mosaic.version = 11 : i64} {
  func.func @_fused_encoder_kernel(%arg0: i32, %arg1: memref<1x64x384xbf16, #tpu.memory_space<vmem>>, %arg2: memref<384x128xbf16, #tpu.memory_space<vmem>>, %arg3: memref<1x128xf32, #tpu.memory_space<vmem>>, %arg4: memref<9x128x128xbf16, #tpu.memory_space<vmem>>, %arg5: memref<1x128xf32, #tpu.memory_space<vmem>>, %arg6: memref<4x128x128xbf16, #tpu.memory_space<vmem>>, %arg7: memref<1x128xf32, #tpu.memory_space<vmem>>, %arg8: memref<1x64x128xf32, #tpu.memory_space<vmem>>, %arg9: memref<96x128xf32, #tpu.memory_space<vmem>>, %arg10: memref<96x128xf32, #tpu.memory_space<vmem>>) attributes {dimension_semantics = [#tpu.dimension_semantics<parallel>], iteration_bounds = array<i64: 2>, scalar_prefetch = 0 : i64, scratch_operands = 2 : i64, tpu.core_type = #tpu.core_type<tc>, window_params = [{transform_indices = @transform_0, window_bounds = array<i64: 1, 64, 384>}, {pipeline_mode = #tpu.pipeline_mode<synchronous>, transform_indices = @transform_1, window_bounds = array<i64: 384, 128>}, {pipeline_mode = #tpu.pipeline_mode<synchronous>, transform_indices = @transform_2, window_bounds = array<i64: 1, 128>}, {pipeline_mode = #tpu.pipeline_mode<synchronous>, transform_indices = @transform_3, window_bounds = array<i64: 9, 128, 128>}, {pipeline_mode = #tpu.pipeline_mode<synchronous>, transform_indices = @transform_4, window_bounds = array<i64: 1, 128>}, {pipeline_mode = #tpu.pipeline_mode<synchronous>, transform_indices = @transform_5, window_bounds = array<i64: 4, 128, 128>}, {pipeline_mode = #tpu.pipeline_mode<synchronous>, transform_indices = @transform_6, window_bounds = array<i64: 1, 128>}, {transform_indices = @transform_7, window_bounds = array<i64: 1, 64, 128>}]} {
    %c0 = arith.constant 0 : index
    %c0_0 = arith.constant 0 : index
    %c0_1 = arith.constant 0 : index
    %0 = vector.load %arg1[%c0, %c0_0, %c0_1] : memref<1x64x384xbf16, #tpu.memory_space<vmem>>, vector<1x64x384xbf16>
    %1 = vector.shape_cast %0 : vector<1x64x384xbf16> to vector<64x384xbf16>
    %c0_2 = arith.constant 0 : index
    %c0_3 = arith.constant 0 : index
    %2 = vector.load %arg2[%c0_2, %c0_3] : memref<384x128xbf16, #tpu.memory_space<vmem>>, vector<384x128xbf16>
    %cst = arith.constant dense<0.000000e+00> : vector<64x128xf32>
    %3 = tpu.matmul %1, %2, %cst {dimension_numbers = #tpu.dot_dimension_numbers<[1], [0], [0], [1], [0, 0, 1, 1], [], []>} : vector<64x384xbf16>, vector<384x128xbf16>, vector<64x128xf32> -> vector<64x128xf32>
    %c0_4 = arith.constant 0 : index
    %c0_5 = arith.constant 0 : index
    %4 = vector.load %arg3[%c0_4, %c0_5] : memref<1x128xf32, #tpu.memory_space<vmem>>, vector<1x128xf32>
    %5 = vector.broadcast %4 : vector<1x128xf32> to vector<64x128xf32>
    %6 = arith.addf %3, %5 : vector<64x128xf32>
    %cst_6 = arith.constant 0.000000e+00 : f32
    %7 = vector.broadcast %cst_6 : f32 to vector<64x128xf32>
    %8 = arith.cmpf oge, %6, %7 : vector<64x128xf32>
    %cst_7 = arith.constant 2.000000e-01 : f32
    %9 = vector.broadcast %cst_7 : f32 to vector<64x128xf32>
    %10 = arith.mulf %9, %6 : vector<64x128xf32>
    %11 = arith.select %8, %6, %10 : vector<64x128xi1>, vector<64x128xf32>
    %12 = arith.truncf %11 : vector<64x128xf32> to vector<64x128xbf16>
    %cst_8 = arith.constant 0.000000e+00 : f32
    %13 = vector.broadcast %cst_8 : f32 to vector<32x128xf32>
    %c64 = arith.constant 64 : index
    %c0_9 = arith.constant 0 : index
    %14 = vector.load %arg9[%c64, %c0_9] : memref<96x128xf32, #tpu.memory_space<vmem>>, vector<32x128xf32>
    tpu.vector_store %arg9[%c64, %c0_9], %13 {strides = array<i32>} : memref<96x128xf32, #tpu.memory_space<vmem>>, vector<32x128xf32>,
    %c0_10 = arith.constant 0 : index
    %c0_11 = arith.constant 0 : index
    %15 = vector.load %arg9[%c0_10, %c0_11] : memref<96x128xf32, #tpu.memory_space<vmem>>, vector<64x128xf32>
    tpu.vector_store %arg9[%c0_10, %c0_11], %11 {strides = array<i32>} : memref<96x128xf32, #tpu.memory_space<vmem>>, vector<64x128xf32>,
    %c0_12 = arith.constant 0 : index
    %c0_13 = arith.constant 0 : index
    %c0_14 = arith.constant 0 : index
    %16 = vector.load %arg4[%c0_12, %c0_13, %c0_14] : memref<9x128x128xbf16, #tpu.memory_space<vmem>>, vector<1x128x128xbf16>
    %17 = vector.shape_cast %16 : vector<1x128x128xbf16> to vector<128x128xbf16>
    %cst_15 = arith.constant dense<0.000000e+00> : vector<64x128xf32>
    %18 = tpu.matmul %12, %17, %cst_15 {dimension_numbers = #tpu.dot_dimension_numbers<[1], [0], [0], [1], [0, 0, 1, 1], [], []>} : vector<64x128xbf16>, vector<128x128xbf16>, vector<64x128xf32> -> vector<64x128xf32>
    %c1 = arith.constant 1 : index
    %c0_16 = arith.constant 0 : index
    %19 = vector.load %arg9[%c1, %c0_16] : memref<96x128xf32, #tpu.memory_space<vmem>>, vector<64x128xf32>
    %20 = arith.truncf %19 : vector<64x128xf32> to vector<64x128xbf16>
    %c1_17 = arith.constant 1 : index
    %c0_18 = arith.constant 0 : index
    %c0_19 = arith.constant 0 : index
    %21 = vector.load %arg4[%c1_17, %c0_18, %c0_19] : memref<9x128x128xbf16, #tpu.memory_space<vmem>>, vector<1x128x128xbf16>
    %22 = vector.shape_cast %21 : vector<1x128x128xbf16> to vector<128x128xbf16>
    %cst_20 = arith.constant dense<0.000000e+00> : vector<64x128xf32>
    %23 = tpu.matmul %20, %22, %cst_20 {dimension_numbers = #tpu.dot_dimension_numbers<[1], [0], [0], [1], [0, 0, 1, 1], [], []>} : vector<64x128xbf16>, vector<128x128xbf16>, vector<64x128xf32> -> vector<64x128xf32>
    %24 = arith.addf %18, %23 : vector<64x128xf32>
    %c2 = arith.constant 2 : index
    %c0_21 = arith.constant 0 : index
    %25 = vector.load %arg9[%c2, %c0_21] : memref<96x128xf32, #tpu.memory_space<vmem>>, vector<64x128xf32>
    %26 = arith.truncf %25 : vector<64x128xf32> to vector<64x128xbf16>
    %c2_22 = arith.constant 2 : index
    %c0_23 = arith.constant 0 : index
    %c0_24 = arith.constant 0 : index
    %27 = vector.load %arg4[%c2_22, %c0_23, %c0_24] : memref<9x128x128xbf16, #tpu.memory_space<vmem>>, vector<1x128x128xbf16>
    %28 = vector.shape_cast %27 : vector<1x128x128xbf16> to vector<128x128xbf16>
    %cst_25 = arith.constant dense<0.000000e+00> : vector<64x128xf32>
    %29 = tpu.matmul %26, %28, %cst_25 {dimension_numbers = #tpu.dot_dimension_numbers<[1], [0], [0], [1], [0, 0, 1, 1], [], []>} : vector<64x128xbf16>, vector<128x128xbf16>, vector<64x128xf32> -> vector<64x128xf32>
    %30 = arith.addf %24, %29 : vector<64x128xf32>
    %c8 = arith.constant 8 : index
    %c0_26 = arith.constant 0 : index
    %31 = vector.load %arg9[%c8, %c0_26] : memref<96x128xf32, #tpu.memory_space<vmem>>, vector<64x128xf32>
    %32 = arith.truncf %31 : vector<64x128xf32> to vector<64x128xbf16>
    %c3 = arith.constant 3 : index
    %c0_27 = arith.constant 0 : index
    %c0_28 = arith.constant 0 : index
    %33 = vector.load %arg4[%c3, %c0_27, %c0_28] : memref<9x128x128xbf16, #tpu.memory_space<vmem>>, vector<1x128x128xbf16>
    %34 = vector.shape_cast %33 : vector<1x128x128xbf16> to vector<128x128xbf16>
    %cst_29 = arith.constant dense<0.000000e+00> : vector<64x128xf32>
    %35 = tpu.matmul %32, %34, %cst_29 {dimension_numbers = #tpu.dot_dimension_numbers<[1], [0], [0], [1], [0, 0, 1, 1], [], []>} : vector<64x128xbf16>, vector<128x128xbf16>, vector<64x128xf32> -> vector<64x128xf32>
    %36 = arith.addf %30, %35 : vector<64x128xf32>
    %c9 = arith.constant 9 : index
    %c0_30 = arith.constant 0 : index
    %37 = vector.load %arg9[%c9, %c0_30] : memref<96x128xf32, #tpu.memory_space<vmem>>, vector<64x128xf32>
    %38 = arith.truncf %37 : vector<64x128xf32> to vector<64x128xbf16>
    %c4 = arith.constant 4 : index
    %c0_31 = arith.constant 0 : index
    %c0_32 = arith.constant 0 : index
    %39 = vector.load %arg4[%c4, %c0_31, %c0_32] : memref<9x128x128xbf16, #tpu.memory_space<vmem>>, vector<1x128x128xbf16>
    %40 = vector.shape_cast %39 : vector<1x128x128xbf16> to vector<128x128xbf16>
    %cst_33 = arith.constant dense<0.000000e+00> : vector<64x128xf32>
    %41 = tpu.matmul %38, %40, %cst_33 {dimension_numbers = #tpu.dot_dimension_numbers<[1], [0], [0], [1], [0, 0, 1, 1], [], []>} : vector<64x128xbf16>, vector<128x128xbf16>, vector<64x128xf32> -> vector<64x128xf32>
    %42 = arith.addf %36, %41 : vector<64x128xf32>
    %c10 = arith.constant 10 : index
    %c0_34 = arith.constant 0 : index
    %43 = vector.load %arg9[%c10, %c0_34] : memref<96x128xf32, #tpu.memory_space<vmem>>, vector<64x128xf32>
    %44 = arith.truncf %43 : vector<64x128xf32> to vector<64x128xbf16>
    %c5 = arith.constant 5 : index
    %c0_35 = arith.constant 0 : index
    %c0_36 = arith.constant 0 : index
    %45 = vector.load %arg4[%c5, %c0_35, %c0_36] : memref<9x128x128xbf16, #tpu.memory_space<vmem>>, vector<1x128x128xbf16>
    %46 = vector.shape_cast %45 : vector<1x128x128xbf16> to vector<128x128xbf16>
    %cst_37 = arith.constant dense<0.000000e+00> : vector<64x128xf32>
    %47 = tpu.matmul %44, %46, %cst_37 {dimension_numbers = #tpu.dot_dimension_numbers<[1], [0], [0], [1], [0, 0, 1, 1], [], []>} : vector<64x128xbf16>, vector<128x128xbf16>, vector<64x128xf32> -> vector<64x128xf32>
    %48 = arith.addf %42, %47 : vector<64x128xf32>
    %c16 = arith.constant 16 : index
    %c0_38 = arith.constant 0 : index
    %49 = vector.load %arg9[%c16, %c0_38] : memref<96x128xf32, #tpu.memory_space<vmem>>, vector<64x128xf32>
    %50 = arith.truncf %49 : vector<64x128xf32> to vector<64x128xbf16>
    %c6 = arith.constant 6 : index
    %c0_39 = arith.constant 0 : index
    %c0_40 = arith.constant 0 : index
    %51 = vector.load %arg4[%c6, %c0_39, %c0_40] : memref<9x128x128xbf16, #tpu.memory_space<vmem>>, vector<1x128x128xbf16>
    %52 = vector.shape_cast %51 : vector<1x128x128xbf16> to vector<128x128xbf16>
    %cst_41 = arith.constant dense<0.000000e+00> : vector<64x128xf32>
    %53 = tpu.matmul %50, %52, %cst_41 {dimension_numbers = #tpu.dot_dimension_numbers<[1], [0], [0], [1], [0, 0, 1, 1], [], []>} : vector<64x128xbf16>, vector<128x128xbf16>, vector<64x128xf32> -> vector<64x128xf32>
    %54 = arith.addf %48, %53 : vector<64x128xf32>
    %c17 = arith.constant 17 : index
    %c0_42 = arith.constant 0 : index
    %55 = vector.load %arg9[%c17, %c0_42] : memref<96x128xf32, #tpu.memory_space<vmem>>, vector<64x128xf32>
    %56 = arith.truncf %55 : vector<64x128xf32> to vector<64x128xbf16>
    %c7 = arith.constant 7 : index
    %c0_43 = arith.constant 0 : index
    %c0_44 = arith.constant 0 : index
    %57 = vector.load %arg4[%c7, %c0_43, %c0_44] : memref<9x128x128xbf16, #tpu.memory_space<vmem>>, vector<1x128x128xbf16>
    %58 = vector.shape_cast %57 : vector<1x128x128xbf16> to vector<128x128xbf16>
    %cst_45 = arith.constant dense<0.000000e+00> : vector<64x128xf32>
    %59 = tpu.matmul %56, %58, %cst_45 {dimension_numbers = #tpu.dot_dimension_numbers<[1], [0], [0], [1], [0, 0, 1, 1], [], []>} : vector<64x128xbf16>, vector<128x128xbf16>, vector<64x128xf32> -> vector<64x128xf32>
    %60 = arith.addf %54, %59 : vector<64x128xf32>
    %c18 = arith.constant 18 : index
    %c0_46 = arith.constant 0 : index
    %61 = vector.load %arg9[%c18, %c0_46] : memref<96x128xf32, #tpu.memory_space<vmem>>, vector<64x128xf32>
    %62 = arith.truncf %61 : vector<64x128xf32> to vector<64x128xbf16>
    %c8_47 = arith.constant 8 : index
    %c0_48 = arith.constant 0 : index
    %c0_49 = arith.constant 0 : index
    %63 = vector.load %arg4[%c8_47, %c0_48, %c0_49] : memref<9x128x128xbf16, #tpu.memory_space<vmem>>, vector<1x128x128xbf16>
    %64 = vector.shape_cast %63 : vector<1x128x128xbf16> to vector<128x128xbf16>
    %cst_50 = arith.constant dense<0.000000e+00> : vector<64x128xf32>
    %65 = tpu.matmul %62, %64, %cst_50 {dimension_numbers = #tpu.dot_dimension_numbers<[1], [0], [0], [1], [0, 0, 1, 1], [], []>} : vector<64x128xbf16>, vector<128x128xbf16>, vector<64x128xf32> -> vector<64x128xf32>
    %66 = arith.addf %60, %65 : vector<64x128xf32>
    %c0_51 = arith.constant 0 : index
    %c0_52 = arith.constant 0 : index
    %67 = vector.load %arg5[%c0_51, %c0_52] : memref<1x128xf32, #tpu.memory_space<vmem>>, vector<1x128xf32>
    %68 = vector.broadcast %67 : vector<1x128xf32> to vector<64x128xf32>
    %69 = arith.addf %66, %68 : vector<64x128xf32>
    %cst_53 = arith.constant 0.000000e+00 : f32
    %70 = vector.broadcast %cst_53 : f32 to vector<64x128xf32>
    %71 = arith.cmpf oge, %69, %70 : vector<64x128xf32>
    %cst_54 = arith.constant 2.000000e-01 : f32
    %72 = vector.broadcast %cst_54 : f32 to vector<64x128xf32>
    %73 = arith.mulf %72, %69 : vector<64x128xf32>
    %74 = arith.select %71, %69, %73 : vector<64x128xi1>, vector<64x128xf32>
    %75 = arith.truncf %74 : vector<64x128xf32> to vector<64x128xbf16>
    %cst_55 = arith.constant 0.000000e+00 : f32
    %76 = vector.broadcast %cst_55 : f32 to vector<32x128xf32>
    %c64_56 = arith.constant 64 : index
    %c0_57 = arith.constant 0 : index
    %77 = vector.load %arg10[%c64_56, %c0_57] : memref<96x128xf32, #tpu.memory_space<vmem>>, vector<32x128xf32>
    tpu.vector_store %arg10[%c64_56, %c0_57], %76 {strides = array<i32>} : memref<96x128xf32, #tpu.memory_space<vmem>>, vector<32x128xf32>,
    %c0_58 = arith.constant 0 : index
    %c0_59 = arith.constant 0 : index
    %78 = vector.load %arg10[%c0_58, %c0_59] : memref<96x128xf32, #tpu.memory_space<vmem>>, vector<64x128xf32>
    tpu.vector_store %arg10[%c0_58, %c0_59], %74 {strides = array<i32>} : memref<96x128xf32, #tpu.memory_space<vmem>>, vector<64x128xf32>,
    %c0_60 = arith.constant 0 : index
    %c0_61 = arith.constant 0 : index
    %c0_62 = arith.constant 0 : index
    %79 = vector.load %arg6[%c0_60, %c0_61, %c0_62] : memref<4x128x128xbf16, #tpu.memory_space<vmem>>, vector<1x128x128xbf16>
    %80 = vector.shape_cast %79 : vector<1x128x128xbf16> to vector<128x128xbf16>
    %cst_63 = arith.constant dense<0.000000e+00> : vector<64x128xf32>
    %81 = tpu.matmul %75, %80, %cst_63 {dimension_numbers = #tpu.dot_dimension_numbers<[1], [0], [0], [1], [0, 0, 1, 1], [], []>} : vector<64x128xbf16>, vector<128x128xbf16>, vector<64x128xf32> -> vector<64x128xf32>
    %c1_64 = arith.constant 1 : index
    %c0_65 = arith.constant 0 : index
    %82 = vector.load %arg10[%c1_64, %c0_65] : memref<96x128xf32, #tpu.memory_space<vmem>>, vector<64x128xf32>
    %83 = arith.truncf %82 : vector<64x128xf32> to vector<64x128xbf16>
    %c1_66 = arith.constant 1 : index
    %c0_67 = arith.constant 0 : index
    %c0_68 = arith.constant 0 : index
    %84 = vector.load %arg6[%c1_66, %c0_67, %c0_68] : memref<4x128x128xbf16, #tpu.memory_space<vmem>>, vector<1x128x128xbf16>
    %85 = vector.shape_cast %84 : vector<1x128x128xbf16> to vector<128x128xbf16>
    %cst_69 = arith.constant dense<0.000000e+00> : vector<64x128xf32>
    %86 = tpu.matmul %83, %85, %cst_69 {dimension_numbers = #tpu.dot_dimension_numbers<[1], [0], [0], [1], [0, 0, 1, 1], [], []>} : vector<64x128xbf16>, vector<128x128xbf16>, vector<64x128xf32> -> vector<64x128xf32>
    %87 = arith.addf %81, %86 : vector<64x128xf32>
    %c8_70 = arith.constant 8 : index
    %c0_71 = arith.constant 0 : index
    %88 = vector.load %arg10[%c8_70, %c0_71] : memref<96x128xf32, #tpu.memory_space<vmem>>, vector<64x128xf32>
    %89 = arith.truncf %88 : vector<64x128xf32> to vector<64x128xbf16>
    %c2_72 = arith.constant 2 : index
    %c0_73 = arith.constant 0 : index
    %c0_74 = arith.constant 0 : index
    %90 = vector.load %arg6[%c2_72, %c0_73, %c0_74] : memref<4x128x128xbf16, #tpu.memory_space<vmem>>, vector<1x128x128xbf16>
    %91 = vector.shape_cast %90 : vector<1x128x128xbf16> to vector<128x128xbf16>
    %cst_75 = arith.constant dense<0.000000e+00> : vector<64x128xf32>
    %92 = tpu.matmul %89, %91, %cst_75 {dimension_numbers = #tpu.dot_dimension_numbers<[1], [0], [0], [1], [0, 0, 1, 1], [], []>} : vector<64x128xbf16>, vector<128x128xbf16>, vector<64x128xf32> -> vector<64x128xf32>
    %93 = arith.addf %87, %92 : vector<64x128xf32>
    %c9_76 = arith.constant 9 : index
    %c0_77 = arith.constant 0 : index
    %94 = vector.load %arg10[%c9_76, %c0_77] : memref<96x128xf32, #tpu.memory_space<vmem>>, vector<64x128xf32>
    %95 = arith.truncf %94 : vector<64x128xf32> to vector<64x128xbf16>
    %c3_78 = arith.constant 3 : index
    %c0_79 = arith.constant 0 : index
    %c0_80 = arith.constant 0 : index
    %96 = vector.load %arg6[%c3_78, %c0_79, %c0_80] : memref<4x128x128xbf16, #tpu.memory_space<vmem>>, vector<1x128x128xbf16>
    %97 = vector.shape_cast %96 : vector<1x128x128xbf16> to vector<128x128xbf16>
    %cst_81 = arith.constant dense<0.000000e+00> : vector<64x128xf32>
    %98 = tpu.matmul %95, %97, %cst_81 {dimension_numbers = #tpu.dot_dimension_numbers<[1], [0], [0], [1], [0, 0, 1, 1], [], []>} : vector<64x128xbf16>, vector<128x128xbf16>, vector<64x128xf32> -> vector<64x128xf32>
    %99 = arith.addf %93, %98 : vector<64x128xf32>
    %c0_82 = arith.constant 0 : index
    %c0_83 = arith.constant 0 : index
    %100 = vector.load %arg7[%c0_82, %c0_83] : memref<1x128xf32, #tpu.memory_space<vmem>>, vector<1x128xf32>
    %101 = vector.broadcast %100 : vector<1x128xf32> to vector<64x128xf32>
    %102 = arith.addf %99, %101 : vector<64x128xf32>
    %cst_84 = arith.constant 0.000000e+00 : f32
    %103 = vector.broadcast %cst_84 : f32 to vector<64x128xf32>
    %104 = arith.cmpf oge, %102, %103 : vector<64x128xf32>
    %cst_85 = arith.constant 2.000000e-01 : f32
    %105 = vector.broadcast %cst_85 : f32 to vector<64x128xf32>
    %106 = arith.mulf %105, %102 : vector<64x128xf32>
    %107 = arith.select %104, %102, %106 : vector<64x128xi1>, vector<64x128xf32>
    %c0_86 = arith.constant 0 : index
    %c0_87 = arith.constant 0 : index
    %c0_88 = arith.constant 0 : index
    %108 = vector.load %arg8[%c0_86, %c0_87, %c0_88] : memref<1x64x128xf32, #tpu.memory_space<vmem>>, vector<1x64x128xf32>
    %109 = vector.shape_cast %108 : vector<1x64x128xf32> to vector<64x128xf32>
    %110 = vector.shape_cast %107 : vector<64x128xf32> to vector<1x64x128xf32>
    tpu.vector_store %arg8[%c0_86, %c0_87, %c0_88], %110 {strides = array<i32>} : memref<1x64x128xf32, #tpu.memory_space<vmem>>, vector<1x64x128xf32>,
    return
  }
  func.func @transform_0(%arg0: i32) -> (i32, i32, i32) {
    %c0_i32 = arith.constant 0 : i32
    %c0_i32_0 = arith.constant 0 : i32
    %c0_i32_1 = arith.constant 0 : i32
    return %arg0, %c0_i32, %c0_i32_0 : i32, i32, i32
  }
  func.func @transform_1(%arg0: i32) -> (i32, i32) {
    %c0_i32 = arith.constant 0 : i32
    %c0_i32_0 = arith.constant 0 : i32
    %c0_i32_1 = arith.constant 0 : i32
    return %c0_i32, %c0_i32_0 : i32, i32
  }
  func.func @transform_2(%arg0: i32) -> (i32, i32) {
    %c0_i32 = arith.constant 0 : i32
    %c0_i32_0 = arith.constant 0 : i32
    %c0_i32_1 = arith.constant 0 : i32
    return %c0_i32, %c0_i32_0 : i32, i32
  }
  func.func @transform_3(%arg0: i32) -> (i32, i32, i32) {
    %c0_i32 = arith.constant 0 : i32
    %c0_i32_0 = arith.constant 0 : i32
    %c0_i32_1 = arith.constant 0 : i32
    %c0_i32_2 = arith.constant 0 : i32
    return %c0_i32, %c0_i32_0, %c0_i32_1 : i32, i32, i32
  }
  func.func @transform_4(%arg0: i32) -> (i32, i32) {
    %c0_i32 = arith.constant 0 : i32
    %c0_i32_0 = arith.constant 0 : i32
    %c0_i32_1 = arith.constant 0 : i32
    return %c0_i32, %c0_i32_0 : i32, i32
  }
  func.func @transform_5(%arg0: i32) -> (i32, i32, i32) {
    %c0_i32 = arith.constant 0 : i32
    %c0_i32_0 = arith.constant 0 : i32
    %c0_i32_1 = arith.constant 0 : i32
    %c0_i32_2 = arith.constant 0 : i32
    return %c0_i32, %c0_i32_0, %c0_i32_1 : i32, i32, i32
  }
  func.func @transform_6(%arg0: i32) -> (i32, i32) {
    %c0_i32 = arith.constant 0 : i32
    %c0_i32_0 = arith.constant 0 : i32
    %c0_i32_1 = arith.constant 0 : i32
    return %c0_i32, %c0_i32_0 : i32, i32
  }
  func.func @transform_7(%arg0: i32) -> (i32, i32, i32) {
    %c0_i32 = arith.constant 0 : i32
    %c0_i32_0 = arith.constant 0 : i32
    %c0_i32_1 = arith.constant 0 : i32
    return %arg0, %c0_i32, %c0_i32_0 : i32, i32, i32
  }
}

</mosaic_0001>

<bundles_post_ra>
// kernel: end_encoder_forward.1
= control target key start
LH: loop header
LB: loop body
LE: loop exit
PB: predicated region body
PF: predicated region fallthrough
CT: control target
= control target key end

     0   :  { %s3207_s24 = smov 0   ;;  %s3851_s0 = inlined_call_operand.vmem [shape: bf16[2,64,384], index: 0, kind: input, shape index: {}]   ;;  %s3852_s1 = inlined_call_operand.vmem [shape: bf16[384,128], index: 1, kind: input, shape index: {}]   ;;  %s3853_s2 = inlined_call_operand.vmem [shape: f32[1,128], index: 2, kind: input, shape index: {}]   ;;  %s3854_s3 = inlined_call_operand.vmem [shape: bf16[9,128,128], index: 3, kind: input, shape index: {}]   ;;  %s3855_s4 = inlined_call_operand.vmem [shape: f32[1,128], index: 4, kind: input, shape index: {}]   ;;  %s3856_s5 = inlined_call_operand.vmem [shape: bf16[4,128,128], index: 5, kind: input, shape index: {}]   ;;  %s3857_s6 = inlined_call_operand.vmem [shape: f32[1,128], index: 6, kind: input, shape index: {}]   ;;  %s3858_s7 = inlined_call_operand.vmem [shape: f32[2,64,128], index: 7, kind: output, shape index: {}]  }
   0x1 LB: > { %s2257_s25 = sadd.s32 4294967295, %s3163_s24   ;;  %p2261_p0 = scmp.ge.s32.totalorder %s3163_s24, 1  ;;  %s3163_s24 = sphi %s3207_s24, %s17_s24  }
   0x2   : > { %p237_p1 = scmp.lt.s32.totalorder %s3163_s24, 3 }
   0x4   : > { %p238_p2 = pnand %p2261_p0, %p237_p1 }
   0x5   : > { %p269_p3 = scmp.lt.s32.totalorder (!%p238_p2), %s2257_s25, 1 }
   0x6   : > { %241 = sbr.rel (%p238_p2) target bundleno = 705 (0x2c1), region = 48 }
   0xb   : > { %v3023_v0 = vld [vmem:[%s3852_s1 + $0x38] sm:$0xff]  ;;  %v3022_v3 = vld [vmem:[%s3852_s1 + $0x30] sm:$0xff]  ;;  %v3021_v6 = vld [vmem:[%s3852_s1 + $0x28] sm:$0xff]  ;;  %s3860_s25 = smov (!%p269_p3, %s2257_s25), 1 }
   0xc   : > { %v3031_v1 = vld [vmem:[%s3852_s1 + $0x78] sm:$0xff]  ;;  %555 = vmatpush.bf16.msra.mxu0 %v3023_v0  ;;  %v3030_v4 = vld [vmem:[%s3852_s1 + $0x70] sm:$0xff]  ;;  %v3029_v7 = vld [vmem:[%s3852_s1 + $0x68] sm:$0xff]  ;;  %s3144_s16 = smul.u32 96, %s3860_s25  ;;  %s3003_s17 = sshll.u32 %s3860_s25, 6 }
   0xd   : > { %v3039_v2 = vld [vmem:[%s3852_s1 + $0xb8] sm:$0xff]  ;;  %584 = vmatpush.bf16.msra.mxu1 %v3031_v1  ;;  %v3038_v5 = vld [vmem:[%s3852_s1 + $0xb0] sm:$0xff]  ;;  %v3037_v8 = vld [vmem:[%s3852_s1 + $0xa8] sm:$0xff]  ;;  %s3831_s20 = scalar_lea.vmem %s3858_s7, %s3003_s17 }
   0xe   : > { %613 = vmatpush.bf16.msra.mxu2 %v3039_v2  ;;  %v3020_v9 = vld [vmem:[%s3852_s1 + $0x20] sm:$0xff]  ;;  %v3019_v12 = vld [vmem:[%s3852_s1 + $0x18] sm:$0xff]  ;;  %v3018_v15 = vld [vmem:[%s3852_s1 + $0x10] sm:$0xff]  ;;  %s3285_s27 = scalar_lea.vmem %s3851_s0, %s3144_s16 }
   0xf   : > { %v3028_v10 = vld [vmem:[%s3852_s1 + $0x60] sm:$0xff]  ;;  %v3027_v13 = vld [vmem:[%s3852_s1 + $0x58] sm:$0xff]  ;;  %v3026_v16 = vld [vmem:[%s3852_s1 + $0x50] sm:$0xff] }
  0x10   : > { %556 = vmatpush.bf16.msra.mxu0 %v3022_v3  ;;  %v3036_v11 = vld [vmem:[%s3852_s1 + $0xa0] sm:$0xff]  ;;  %v3035_v14 = vld [vmem:[%s3852_s1 + $0x98] sm:$0xff]  ;;  %v3034_v17 = vld [vmem:[%s3852_s1 + $0x90] sm:$0xff] }
  0x11   : > { %585 = vmatpush.bf16.msra.mxu1 %v3030_v4  ;;  %v3017_v18 = vld [vmem:[%s3852_s1 + $0x8] sm:$0xff]  ;;  %v3016_v21 = vld [vmem:[%s3852_s1] sm:$0xff]  ;;  %v2269_v26 = vld [vmem:[%s3285_s27 + $0xc] sm:$0xf0] }
  0x12   : > { %614 = vmatpush.bf16.msra.mxu2 %v3038_v5  ;;  %v3025_v19 = vld [vmem:[%s3852_s1 + $0x48] sm:$0xff]  ;;  %v3024_v22 = vld [vmem:[%s3852_s1 + $0x40] sm:$0xff]  ;;  %v3006_v29 = vld [vmem:[%s3285_s27 + $0x10] sm:$0xf0] }
  0x13   : > { %v3033_v20 = vld [vmem:[%s3852_s1 + $0x88] sm:$0xff]  ;;  %v2267_v23 = vld [vmem:[%s3285_s27] sm:$0xf]  ;;  %v3004_v25 = vld [vmem:[%s3285_s27 + $0x4] sm:$0xf] }
  0x14   : > { %557 = vmatpush.bf16.msra.mxu0 %v3021_v6  ;;  %v3005_v24 = vld [vmem:[%s3285_s27 + $0x8] sm:$0xf0]  ;;  %v3032_v27 = vld [vmem:[%s3852_s1 + $0x80] sm:$0xff]  ;;  %v2275_v28 = vld [vmem:[%s3285_s27 + $0x8] sm:$0xf]  ;;  %v2272_v31 = vor.u32 %v3004_v25, %v2269_v26 }
  0x15   : > { %586 = vmatpush.bf16.msra.mxu1 %v3029_v7  ;;  %v2268_v30 = vor.u32 %v3005_v24, %v2267_v23  ;;  %v2276_v32 = vor.u32 %v3006_v29, %v2275_v28  ;;  %v2279_v33 = vld [vmem:[%s3285_s27 + $0x18] sm:$0xf]  ;;  %v3008_v34 = vld [vmem:[%s3285_s27 + $0x20] sm:$0xf0]  ;;  %v3007_v35 = vld [vmem:[%s3285_s27 + $0x1c] sm:$0xf] }
  0x16   : > { %615 = vmatpush.bf16.msra.mxu2 %v3037_v8  ;;  %v2281_v36 = vld [vmem:[%s3285_s27 + $0x24] sm:$0xf0]  ;;  %v2287_v37 = vld [vmem:[%s3285_s27 + $0x20] sm:$0xf]  ;;  %v3009_v38 = vld [vmem:[%s3285_s27 + $0x28] sm:$0xf0]  ;;  %v2280_v39 = vor.u32 %v3008_v34, %v2279_v33 }
  0x17   : > { %v2284_v40 = vor.u32 %v3007_v35, %v2281_v36  ;;  %v2288_v41 = vor.u32 %v3009_v38, %v2287_v37  ;;  %v3047_v42 = vld [vmem:[%s3854_s3 + $0x38] sm:$0xff]  ;;  %v3046_v43 = vld [vmem:[%s3854_s3 + $0x30] sm:$0xff]  ;;  %v3045_v44 = vld [vmem:[%s3854_s3 + $0x28] sm:$0xff] }
  0x18   : > { %558 = vmatpush.bf16.msra.mxu0 %v3020_v9  ;;  %v2291_v45 = vld [vmem:[%s3285_s27 + $0x30] sm:$0xf]  ;;  %v3011_v46 = vld [vmem:[%s3285_s27 + $0x38] sm:$0xf0]  ;;  %v3010_v47 = vld [vmem:[%s3285_s27 + $0x34] sm:$0xf] }
  0x19   : > { %587 = vmatpush.bf16.msra.mxu1 %v3028_v10  ;;  %v2293_v48 = vld [vmem:[%s3285_s27 + $0x3c] sm:$0xf0]  ;;  %v2299_v49 = vld [vmem:[%s3285_s27 + $0x38] sm:$0xf]  ;;  %v3012_v50 = vld [vmem:[%s3285_s27 + $0x40] sm:$0xf0]  ;;  %v2292_v51 = vor.u32 %v3011_v46, %v2291_v45 }
  0x1a   : > { %616 = vmatpush.bf16.msra.mxu2 %v3036_v11  ;;  %v2296_v52 = vor.u32 %v3010_v47, %v2293_v48  ;;  %v2300_v53 = vor.u32 %v3012_v50, %v2299_v49  ;;  %v2303_v54 = vld [vmem:[%s3285_s27 + $0x48] sm:$0xf]  ;;  %v3014_v55 = vld [vmem:[%s3285_s27 + $0x50] sm:$0xf0]  ;;  %v3013_v56 = vld [vmem:[%s3285_s27 + $0x4c] sm:$0xf] }
  0x1b   : > { %v2305_v57 = vld [vmem:[%s3285_s27 + $0x54] sm:$0xf0]  ;;  %v2311_v58 = vld [vmem:[%s3285_s27 + $0x50] sm:$0xf]  ;;  %v3015_v59 = vld [vmem:[%s3285_s27 + $0x58] sm:$0xf0]  ;;  %v2304_v60 = vor.u32 %v3014_v55, %v2303_v54 }
  0x1c   : > { %559 = vmatpush.bf16.msra.mxu0 %v3019_v12  ;;  %v2308_v61 = vor.u32 %v3013_v56, %v2305_v57  ;;  %v2312_v62 = vor.u32 %v3015_v59, %v2311_v58  ;;  %v3071_v63 = vld [vmem:[%s3854_s3 + $0xf8] sm:$0xff]  ;;  %v3044_v0 = vld [vmem:[%s3854_s3 + $0x20] sm:$0xff]  ;;  %v3070_v1 = vld [vmem:[%s3854_s3 + $0xf0] sm:$0xff] }
  0x1d   : > { %588 = vmatpush.bf16.msra.mxu1 %v3027_v13  ;;  %v3055_v2 = vld [vmem:[%s3854_s3 + $0x78] sm:$0xff]  ;;  %v3069_v5 = vld [vmem:[%s3854_s3 + $0xe8] sm:$0xff]  ;;  %v3054_v6 = vld [vmem:[%s3854_s3 + $0x70] sm:$0xff] }
  0x1e   : > { %617 = vmatpush.bf16.msra.mxu2 %v3035_v14  ;;  %v3043_v3 = vld [vmem:[%s3854_s3 + $0x18] sm:$0xff]  ;;  %775 = vmatpush.bf16.msra.mxu3 %v3055_v2  ;;  %v3042_v7 = vld [vmem:[%s3854_s3 + $0x10] sm:$0xff]  ;;  %v3068_v9 = vld [vmem:[%s3854_s3 + $0xe0] sm:$0xff] }
  0x1f   : > { %v3063_v4 = vld [vmem:[%s3854_s3 + $0xb8] sm:$0xff]  ;;  %v3062_v8 = vld [vmem:[%s3854_s3 + $0xb0] sm:$0xff]  ;;  %v3053_v10 = vld [vmem:[%s3854_s3 + $0x68] sm:$0xff] }
  0x20   : > { %560 = vmatpush.bf16.msra.mxu0 %v3018_v15  ;;  %v3041_v11 = vld [vmem:[%s3854_s3 + $0x8] sm:$0xff]  ;;  %v3067_v13 = vld [vmem:[%s3854_s3 + $0xd8] sm:$0xff]  ;;  %v3052_v14 = vld [vmem:[%s3854_s3 + $0x60] sm:$0xff] }
  0x21   : > { %589 = vmatpush.bf16.msra.mxu1 %v3026_v16  ;;  %v3061_v12 = vld [vmem:[%s3854_s3 + $0xa8] sm:$0xff]  ;;  %v3040_v15 = vld [vmem:[%s3854_s3] sm:$0xff]  ;;  %v3078_v48 = vld [vmem:[%s3854_s3 + $0x130] sm:$0xff] }
  0x22   : > { %618 = vmatpush.bf16.msra.mxu2 %v3034_v17  ;;  %776 = vmatpush.bf16.msra.mxu3 %v3054_v6  ;;  %v3060_v16 = vld [vmem:[%s3854_s3 + $0xa0] sm:$0xff]  ;;  %v3066_v17 = vld [vmem:[%s3854_s3 + $0xd0] sm:$0xff]  ;;  %v3049_v25 = vld [vmem:[%s3854_s3 + $0x48] sm:$0xff] }
  0x23   : > { %v3064_v23 = vld [vmem:[%s3854_s3 + $0xc0] sm:$0xff]  ;;  %v3057_v26 = vld [vmem:[%s3854_s3 + $0x88] sm:$0xff]  ;;  %v3086_v59 = vld [vmem:[%s3854_s3 + $0x170] sm:$0xff] }
  0x24   : > { %561 = vmatpush.bf16.msra.mxu0 %v3017_v18  ;;  %v3051_v18 = vld [vmem:[%s3854_s3 + $0x58] sm:$0xff]  ;;  %v3410_v24 = vld [vmem:[%s3853_s2] ss:$0 sm:$0xff] }
  0x25   : > { %590 = vmatpush.bf16.msra.mxu1 %v3025_v19  ;;  %v3059_v19 = vld [vmem:[%s3854_s3 + $0x98] sm:$0xff] }
  0x26   : > { %619 = vmatpush.bf16.msra.mxu2 %v3033_v20  ;;  %777 = vmatpush.bf16.msra.mxu3 %v3053_v10  ;;  %v3065_v20 = vld [vmem:[%s3854_s3 + $0xc8] sm:$0xff]  ;;  %v3103_v2 = vld [vmem:[%s3854_s3 + $0x1f8] sm:$0xff] }
  0x28   : > { %562 = vmatpush.bf16.msra.mxu0 %v3016_v21  ;;  %v3050_v21 = vld [vmem:[%s3854_s3 + $0x50] sm:$0xff] }
  0x29   : > { %591 = vmatpush.bf16.msra.mxu1 %v3024_v22  ;;  %v3058_v22 = vld [vmem:[%s3854_s3 + $0x90] sm:$0xff] }
  0x2a   : > { %620 = vmatpush.bf16.msra.mxu2 %v3032_v27  ;;  %778 = vmatpush.bf16.msra.mxu3 %v3052_v14 }
  0x2b   : > { %563 = vmatmul.bf16.vlgmr.msra.gmra.mxu0 %v2268_v30  ;;  %v3048_v30 = vld [vmem:[%s3854_s3 + $0x40] sm:$0xff] }
  0x2c   : > { %592 = vmatmul.bf16.vlgmr.msra.gmra.mxu1 %v2272_v31  ;;  %852 = vmatpush.bf16.msrb.mxu0 %v3047_v42  ;;  %v3056_v31 = vld [vmem:[%s3854_s3 + $0x80] sm:$0xff] }
  0x2d   : > { %621 = vmatmul.bf16.vlgmr.msra.gmra.mxu2 %v2276_v32  ;;  %958 = vmatpush.bf16.msrb.mxu1 %v3063_v4 }
  0x2e   : > { %1072 = vmatpush.bf16.msrb.mxu2 %v3071_v63  ;;  %779 = vmatpush.bf16.msra.mxu3 %v3051_v18 }
  0x30   : > { %853 = vmatpush.bf16.msrb.mxu0 %v3046_v43 }
  0x31   : > { %959 = vmatpush.bf16.msrb.mxu1 %v3062_v8  ;;  %v3076_v8 = vld [vmem:[%s3854_s3 + $0x120] sm:$0xff] }
  0x32   : > { %1073 = vmatpush.bf16.msrb.mxu2 %v3070_v1  ;;  %780 = vmatpush.bf16.msra.mxu3 %v3050_v21  ;;  %v3085_v1 = vld [vmem:[%s3854_s3 + $0x168] sm:$0xff] }
  0x34   : > { %854 = vmatpush.bf16.msrb.mxu0 %v3045_v44 }
  0x35   : > { %960 = vmatpush.bf16.msrb.mxu1 %v3061_v12 }
  0x36   : > { %1074 = vmatpush.bf16.msrb.mxu2 %v3069_v5  ;;  %781 = vmatpush.bf16.msra.mxu3 %v3049_v25  ;;  %v3101_v25 = vld [vmem:[%s3854_s3 + $0x1e8] sm:$0xff] }
  0x38   : > { %855 = vmatpush.bf16.msrb.mxu0 %v3044_v0 }
  0x39   : > { %961 = vmatpush.bf16.msrb.mxu1 %v3060_v16 }
  0x3a   : > { %1075 = vmatpush.bf16.msrb.mxu2 %v3068_v9  ;;  %782 = vmatpush.bf16.msra.mxu3 %v3048_v30  ;;  %v3084_v9 = vld [vmem:[%s3854_s3 + $0x160] sm:$0xff]  ;;  %v3082_v30 = vld [vmem:[%s3854_s3 + $0x150] sm:$0xff] }
  0x3b   : > { %568 = vmatmul.bf16.gmra.mxu0 %v2280_v39 }
  0x3c   : > { %597 = vmatmul.bf16.gmra.mxu1 %v2284_v40  ;;  %856 = vmatpush.bf16.msrb.mxu0 %v3043_v3  ;;  %v3079_v40 = vld [vmem:[%s3854_s3 + $0x138] sm:$0xff] }
  0x3d   : > { %626 = vmatmul.bf16.gmra.mxu2 %v2288_v41  ;;  %962 = vmatpush.bf16.msrb.mxu1 %v3059_v19 }
  0x3e   : > { %1076 = vmatpush.bf16.msrb.mxu2 %v3067_v13  ;;  %1186 = vmatpush.bf16.msrb.mxu3 %v3079_v40 }
  0x40   : > { %857 = vmatpush.bf16.msrb.mxu0 %v3042_v7 }
  0x41   : > { %963 = vmatpush.bf16.msrb.mxu1 %v3058_v22  ;;  %v3083_v22 = vld [vmem:[%s3854_s3 + $0x158] sm:$0xff] }
  0x42   : > { %1077 = vmatpush.bf16.msrb.mxu2 %v3066_v17  ;;  %1187 = vmatpush.bf16.msrb.mxu3 %v3078_v48 }
  0x44   : > { %858 = vmatpush.bf16.msrb.mxu0 %v3041_v11  ;;  %v3102_v11 = vld [vmem:[%s3854_s3 + $0x1f0] sm:$0xff] }
  0x45   : > { %964 = vmatpush.bf16.msrb.mxu1 %v3057_v26 }
  0x46   : > { %1078 = vmatpush.bf16.msrb.mxu2 %v3065_v20  ;;  %v3165_v20 = vmov 0.0  }
  0x47   : > { %670 = vst [vmem:[#allocation2 + $0x40] sm:$0xff] %v3165_v20 }
  0x48   : > { %859 = vmatpush.bf16.msrb.mxu0 %v3040_v15  ;;  %671 = vst [vmem:[#allocation2 + $0x48] sm:$0xff] %v3165_v20 }
  0x49   : > { %965 = vmatpush.bf16.msrb.mxu1 %v3056_v31  ;;  %v3094_v31 = vld [vmem:[%s3854_s3 + $0x1b0] sm:$0xff]  ;;  %672 = vst [vmem:[#allocation2 + $0x50] sm:$0xff] %v3165_v20 }
  0x4a   : > { %1079 = vmatpush.bf16.msrb.mxu2 %v3064_v23  ;;  %v3095_v23 = vld [vmem:[%s3854_s3 + $0x1b8] sm:$0xff]  ;;  %1719 = vst [vmem:[#allocation3 + $0x40] sm:$0xff] %v3165_v20 }
  0x4b   : > { %573 = vmatmul.bf16.gmra.mxu0 %v2292_v51  ;;  %1720 = vst [vmem:[#allocation3 + $0x48] sm:$0xff] %v3165_v20 }
  0x4c   : > { %602 = vmatmul.bf16.gmra.mxu1 %v2296_v52 }
  0x4d   : > { %631 = vmatmul.bf16.gmra.mxu2 %v2300_v53  ;;  %v3087_v53 = vld [vmem:[%s3854_s3 + $0x178] sm:$0xff]  ;;  %1414 = vmatpush.bf16.msra.mxu1 %v3095_v23 }
  0x4e   : > { %1300 = vmatpush.bf16.msra.mxu0 %v3087_v53  ;;  %1528 = vmatpush.bf16.msra.mxu2 %v3103_v2  ;;  %v3090_v2 = vld [vmem:[%s3854_s3 + $0x190] sm:$0xff] }
  0x51   : > { %1415 = vmatpush.bf16.msra.mxu1 %v3094_v31 }
  0x52   : > { %1301 = vmatpush.bf16.msra.mxu0 %v3086_v59  ;;  %1529 = vmatpush.bf16.msra.mxu2 %v3102_v11 }
  0x56   : > { %1302 = vmatpush.bf16.msra.mxu0 %v3085_v1  ;;  %1530 = vmatpush.bf16.msra.mxu2 %v3101_v25  ;;  %v3073_v1 = vld [vmem:[%s3854_s3 + $0x108] sm:$0xff] }
  0x5a   : > { %1303 = vmatpush.bf16.msra.mxu0 %v3084_v9 }
  0x5b   : > { %578 = vmatmul.bf16.gmra.mxu0 %v2304_v60 }
  0x5c   : > { %607 = vmatmul.bf16.gmra.mxu1 %v2308_v61 }
  0x5d   : > { %636 = vmatmul.bf16.gmra.mxu2 %v2312_v62  ;;  %v3077_v62 = vld [vmem:[%s3854_s3 + $0x128] sm:$0xff] }
  0x5e   : > { %1188 = vmatpush.bf16.msrb.mxu3 %v3077_v62  ;;  %1304 = vmatpush.bf16.msra.mxu0 %v3083_v22  ;;  %v3097_v62 = vld [vmem:[%s3854_s3 + $0x1c8] sm:$0xff] }
  0x62   : > { %1189 = vmatpush.bf16.msrb.mxu3 %v3076_v8  ;;  %1305 = vmatpush.bf16.msra.mxu0 %v3082_v30 }
  0xa8   : > { %v564_v27 = vpop.f32.mrf.mxu0 }
  0xa9   : > { %v593_v28 = vpop.f32.mrf.mxu1  ;;  %v565_v29 = vadd.f32 %v3410_v24, %v564_v27 }
  0xab   : > { %v594_v32 = vadd.f32 %v593_v28, %v565_v29  ;;  %v3075_v28 = vld [vmem:[%s3854_s3 + $0x118] sm:$0xff] }
  0xac   : > { %1190 = vmatpush.bf16.msrb.mxu3 %v3075_v28  ;;  %v3110_v28 = vld [vmem:[%s3854_s3 + $0x230] sm:$0xff] }
  0xb0   : > { %v622_v33 = vpop.f32.mrf.mxu2  ;;  %v566_v35 = vpop.f32.mrf.mxu0 }
  0xb1   : > { %v623_v34 = vadd.f32 %v622_v33, %v594_v32  ;;  %v595_v36 = vpop.f32.mrf.mxu1  ;;  %v567_v38 = vadd.f32 %v3410_v24, %v566_v35  ;;  %v3100_v35 = vld [vmem:[%s3854_s3 + $0x1e0] sm:$0xff] }
  0xb2   : > { %1531 = vmatpush.bf16.msra.mxu2 %v3100_v35 }
  0xb3   : > { %vm642_vm0 = vcmp.ge.f32.partialorder %v623_v34, 0.0  ;;  %v650_v37 = vmul.f32 0.2, %v623_v34  ;;  %v596_v41 = vadd.f32 %v595_v36, %v567_v38  ;;  %v3081_v38 = vld [vmem:[%s3854_s3 + $0x148] sm:$0xff] }
  0xb4   : > { %1306 = vmatpush.bf16.msra.mxu0 %v3081_v38  ;;  %v3108_v38 = vld [vmem:[%s3854_s3 + $0x220] sm:$0xff] }
  0xb5   : > { %v658_v39 = vsel %vm642_vm0, %v623_v34, %v650_v37  ;;  %v3074_v34 = vld [vmem:[%s3854_s3 + $0x110] sm:$0xff] }
  0xb6   : > { %674 = vst [vmem:[#allocation2] sm:$0xff] %v658_v39  ;;  %1191 = vmatpush.bf16.msrb.mxu3 %v3074_v34 }
  0xb8   : > { %v624_v42 = vpop.f32.mrf.mxu2  ;;  %v569_v44 = vpop.f32.mrf.mxu0 }
  0xb9   : > { %v625_v43 = vadd.f32 %v624_v42, %v596_v41  ;;  %v598_v45 = vpop.f32.mrf.mxu1  ;;  %v570_v46 = vadd.f32 %v3410_v24, %v569_v44  ;;  %v3099_v42 = vld [vmem:[%s3854_s3 + $0x1d8] sm:$0xff] }
  0xba   : > { %1532 = vmatpush.bf16.msra.mxu2 %v3099_v42  ;;  %1192 = vmatpush.bf16.msrb.mxu3 %v3073_v1 }
  0xbb   : > { %vm643_vm1 = vcmp.ge.f32.partialorder %v625_v43, 0.0  ;;  %v651_v47 = vmul.f32 0.2, %v625_v43  ;;  %v599_v49 = vadd.f32 %v598_v45, %v570_v46  ;;  %v3080_v46 = vld [vmem:[%s3854_s3 + $0x140] sm:$0xff] }
  0xbc   : > { %1307 = vmatpush.bf16.msra.mxu0 %v3080_v46 }
  0xbd   : > { %v659_v50 = vsel %vm643_vm1, %v625_v43, %v651_v47  ;;  %v3092_v47 = vld [vmem:[%s3854_s3 + $0x1a0] sm:$0xff] }
  0xbe   : > { %v666_v51 = vpack.c.bf16 %v659_v50, %v658_v39  ;;  %675 = vst [vmem:[#allocation2 + $0x8] sm:$0xff] %v659_v50  ;;  %v3093_v39 = vld [vmem:[%s3854_s3 + $0x1a8] sm:$0xff] }
  0xbf   : > { %1416 = vmatpush.bf16.msra.mxu1 %v3093_v39 }
  0xc0   : > { %v627_v52 = vpop.f32.mrf.mxu2  ;;  %860 = vmatmul.bf16.vlgmr.msrb.gmra.mxu0 %v666_v51  ;;  %v571_v55 = vpop.f32.mrf.mxu0  ;;  %v3098_v51 = vld [vmem:[%s3854_s3 + $0x1d0] sm:$0xff] }
  0xc1   : > { %v628_v54 = vadd.f32 %v627_v52, %v599_v49  ;;  %v600_v56 = vpop.f32.mrf.mxu1  ;;  %v572_v58 = vadd.f32 %v3410_v24, %v571_v55  ;;  %1533 = vmatpush.bf16.msra.mxu2 %v3098_v51  ;;  %v3166_v51 = vmov 0.0|0.0  }
  0xc3   : > { %vm644_vm2 = vcmp.ge.f32.partialorder %v628_v54, 0.0  ;;  %v652_v57 = vmul.f32 0.2, %v628_v54  ;;  %v601_v63 = vadd.f32 %v600_v56, %v572_v58  ;;  %1417 = vmatpush.bf16.msra.mxu1 %v3092_v47  ;;  %v1458_v47 = vld [vmem:[#allocation2 + $0x49] sm:$0xff] }
  0xc5   : > { %v660_v60 = vsel %vm644_vm2, %v628_v54, %v652_v57  ;;  %v698_v10 = vld [vmem:[#allocation2 + $0x1] sm:$0xff]  ;;  %1534 = vmatpush.bf16.msra.mxu2 %v3097_v62  ;;  %v1572_v62 = vld [vmem:[#allocation2 + $0x4a] sm:$0xff] }
  0xc6   : > { %676 = vst [vmem:[#allocation2 + $0x10] sm:$0xff] %v660_v60  ;;  %v1003_v61 = vpack.c.bf16 %v660_v60, %v659_v50  ;;  %v881_v15 = vld [vmem:[#allocation2 + $0x2] sm:$0xff] }
  0xc8   : > { %v629_v0 = vpop.f32.mrf.mxu2  ;;  %1080 = vmatmul.bf16.vlgmr.msrb.gmra.mxu2 %v1003_v61  ;;  %v574_v4 = vpop.f32.mrf.mxu0  ;;  %v3091_v61 = vld [vmem:[%s3854_s3 + $0x198] sm:$0xff] }
  0xc9   : > { %v630_v3 = vadd.f32 %v629_v0, %v601_v63  ;;  %v603_v5 = vpop.f32.mrf.mxu1  ;;  %v575_v6 = vadd.f32 %v3410_v24, %v574_v4  ;;  %1418 = vmatpush.bf16.msra.mxu1 %v3091_v61 }
  0xcb   : > { %v653_v7 = vmul.f32 0.2, %v630_v3  ;;  %vm645_vm3 = vcmp.ge.f32.partialorder %v630_v3, 0.0  ;;  %v604_v12 = vadd.f32 %v603_v5, %v575_v6  ;;  %v3072_v5 = vld [vmem:[%s3854_s3 + $0x100] sm:$0xff] }
  0xcc   : > { %v3096_v6 = vld [vmem:[%s3854_s3 + $0x1c0] sm:$0xff]  ;;  %1193 = vmatpush.bf16.msrb.mxu3 %v3072_v5 }
  0xcd   : > { %v3459_v13 = vld [vmem:[#allocation2 + $0x9] sm:$0xff]  ;;  %v661_v14 = vsel %vm645_vm3, %v630_v3, %v653_v7  ;;  %1419 = vmatpush.bf16.msra.mxu1 %v3090_v2  ;;  %1535 = vmatpush.bf16.msra.mxu2 %v3096_v6 }
  0xce   : > { %v3461_v16 = vld [vmem:[#allocation2 + $0xa] sm:$0xff]  ;;  %v706_v17 = vpack.c.bf16 %v3459_v13, %v698_v10  ;;  %v3464_v18 = vpack.c.bf16 %v661_v14, %v660_v60  ;;  %677 = vst [vmem:[#allocation2 + $0x18] sm:$0xff] %v661_v14 }
  0xcf   : > { %v889_v19 = vpack.c.bf16 %v3461_v16, %v881_v15  ;;  %v3089_v10 = vld [vmem:[%s3854_s3 + $0x188] sm:$0xff]  ;;  %v3088_v15 = vld [vmem:[%s3854_s3 + $0x180] sm:$0xff] }
  0xd0   : > { %v632_v21 = vpop.f32.mrf.mxu2  ;;  %783 = vmatmul.bf16.vlgmr.msra.gmra.mxu3 %v706_v17  ;;  %865 = vmatmul.bf16.gmra.mxu0 %v3464_v18  ;;  %v576_v27 = vpop.f32.mrf.mxu0 }
  0xd1   : > { %v633_v26 = vadd.f32 %v632_v21, %v604_v12  ;;  %966 = vmatmul.bf16.vlgmr.msrb.gmra.mxu1 %v889_v19  ;;  %v605_v29 = vpop.f32.mrf.mxu1  ;;  %v577_v33 = vadd.f32 %v3410_v24, %v576_v27  ;;  %v3111_v27 = vld [vmem:[%s3854_s3 + $0x238] sm:$0xff] }
  0xd2   : > { %1420 = vmatpush.bf16.msra.mxu1 %v3089_v10  ;;  %1642 = vmatpush.bf16.msra.mxu3 %v3111_v27 }
  0xd3   : > { %vm646_vm4 = vcmp.ge.f32.partialorder %v633_v26, 0.0  ;;  %v654_v32 = vmul.f32 0.2, %v633_v26  ;;  %v606_v40 = vadd.f32 %v605_v29, %v577_v33 }
  0xd5   : > { %v662_v36 = vsel %vm646_vm4, %v633_v26, %v654_v32  ;;  %v3509_v50 = vld [vmem:[#allocation2 + $0x11] sm:$0xff] }
  0xd6   : > { %678 = vst [vmem:[#allocation2 + $0x20] sm:$0xff] %v662_v36  ;;  %v1004_v37 = vpack.c.bf16 %v662_v36, %v661_v14  ;;  %v3516_v55 = vld [vmem:[#allocation2 + $0x12] sm:$0xff]  ;;  %1421 = vmatpush.bf16.msra.mxu1 %v3088_v15  ;;  %1643 = vmatpush.bf16.msra.mxu3 %v3110_v28  ;;  %v1117_v39 = vpack.c.bf16 %v3509_v50, %v3459_v13 }
  0xd7   : > { %v1231_v35 = vpack.c.bf16 %v3516_v55, %v3461_v16 }
  0xd8   : > { %v634_v41 = vpop.f32.mrf.mxu2  ;;  %1085 = vmatmul.bf16.gmra.mxu2 %v1004_v37  ;;  %v579_v44 = vpop.f32.mrf.mxu0  ;;  %v3109_v37 = vld [vmem:[%s3854_s3 + $0x228] sm:$0xff] }
  0xd9   : > { %v635_v43 = vadd.f32 %v634_v41, %v606_v40  ;;  %v580_v45 = vadd.f32 %v3410_v24, %v579_v44  ;;  %v608_v49 = vpop.f32.mrf.mxu1  ;;  %v3107_v40 = vld [vmem:[%s3854_s3 + $0x218] sm:$0xff]  ;;  %v3106_v41 = vld [vmem:[%s3854_s3 + $0x210] sm:$0xff]  ;;  %v1230_v44 = vld [vmem:[#allocation2 + $0x42] sm:$0xff] }
  0xda   : > { %1644 = vmatpush.bf16.msra.mxu3 %v3109_v37  ;;  %v3125_v37 = vld [vmem:[%s3856_s5 + $0x68] sm:$0xff] }
  0xdb   : > { %v655_v48 = vmul.f32 0.2, %v635_v43  ;;  %vm647_vm5 = vcmp.ge.f32.partialorder %v635_v43, 0.0  ;;  %v609_v52 = vadd.f32 %v608_v49, %v580_v45 }
  0xdd   : > { %v3514_v53 = vld [vmem:[#allocation2 + $0x19] sm:$0xff]  ;;  %v663_v54 = vsel %vm647_vm5, %v635_v43, %v655_v48  ;;  %v1116_v48 = vld [vmem:[#allocation2 + $0x41] sm:$0xff] }
  0xde   : > { %v3518_v56 = vld [vmem:[#allocation2 + $0x1a] sm:$0xff]  ;;  %v3522_v57 = vpack.c.bf16 %v3514_v53, %v3509_v50  ;;  %v3524_v58 = vpack.c.bf16 %v663_v54, %v662_v36  ;;  %679 = vst [vmem:[#allocation2 + $0x28] sm:$0xff] %v663_v54  ;;  %1645 = vmatpush.bf16.msra.mxu3 %v3108_v38  ;;  %v1462_v49 = vpack.c.bf16 %v1458_v47, %v1116_v48 }
  0xdf   : > { %v3528_v59 = vpack.c.bf16 %v3518_v56, %v3516_v55  ;;  %v3104_v43 = vld [vmem:[%s3854_s3 + $0x200] sm:$0xff] }
  0xe0   : > { %v637_v60 = vpop.f32.mrf.mxu2  ;;  %788 = vmatmul.bf16.gmra.mxu3 %v3522_v57  ;;  %870 = vmatmul.bf16.gmra.mxu0 %v3524_v58  ;;  %v581_v0 = vpop.f32.mrf.mxu0 }
  0xe1   : > { %v638_v63 = vadd.f32 %v637_v60, %v609_v52  ;;  %971 = vmatmul.bf16.gmra.mxu1 %v3528_v59  ;;  %v582_v4 = vadd.f32 %v3410_v24, %v581_v0  ;;  %v610_v8 = vpop.f32.mrf.mxu1  ;;  %v1576_v0 = vpack.c.bf16 %v1572_v62, %v1230_v44  ;;  %v3112_v62 = vld [vmem:[%s3856_s5] sm:$0xff] }
  0xe2   : > { %1646 = vmatpush.bf16.msra.mxu3 %v3107_v40 }
  0xe3   : > { %vm648_vm6 = vcmp.ge.f32.partialorder %v638_v63, 0.0  ;;  %v656_v3 = vmul.f32 0.2, %v638_v63  ;;  %v611_v24 = vadd.f32 %v610_v8, %v582_v4 }
  0xe5   : > { %v664_v7 = vsel %vm648_vm6, %v638_v63, %v656_v3  ;;  %v702_v17 = vld [vmem:[#allocation2 + $0x21] sm:$0xff] }
  0xe6   : > { %680 = vst [vmem:[#allocation2 + $0x30] sm:$0xff] %v664_v7  ;;  %v1005_v9 = vpack.c.bf16 %v664_v7, %v663_v54  ;;  %v885_v21 = vld [vmem:[#allocation2 + $0x22] sm:$0xff]  ;;  %1647 = vmatpush.bf16.msra.mxu3 %v3106_v41  ;;  %v1118_v42 = vpack.c.bf16 %v702_v17, %v3514_v53  ;;  %v3115_v41 = vld [vmem:[%s3856_s5 + $0x18] sm:$0xff] }
  0xe7   : > { %v1232_v16 = vpack.c.bf16 %v885_v21, %v3518_v56 }
  0xe8   : > { %v639_v11 = vpop.f32.mrf.mxu2  ;;  %1090 = vmatmul.bf16.gmra.mxu2 %v1005_v9 }
  0xe9   : > { %v640_v12 = vadd.f32 %v639_v11, %v611_v24 }
  0xeb   : > { %v657_v14 = vmul.f32 0.2, %v640_v12  ;;  %vm649_vm7 = vcmp.ge.f32.partialorder %v640_v12, 0.0 }
  0xed   : > { %v703_v19 = vld [vmem:[#allocation2 + $0x29] sm:$0xff]  ;;  %v665_v20 = vsel %vm649_vm7, %v640_v12, %v657_v14 }
  0xee   : > { %v886_v22 = vld [vmem:[#allocation2 + $0x2a] sm:$0xff]  ;;  %v708_v23 = vpack.c.bf16 %v703_v19, %v702_v17  ;;  %v669_v25 = vpack.c.bf16 %v665_v20, %v664_v7  ;;  %681 = vst [vmem:[#allocation2 + $0x38] sm:$0xff] %v665_v20  ;;  %v1006_v29 = vpack.c.bf16 0.0, %v665_v20  ;;  %v3143_v20 = vld [vmem:[%s3856_s5 + $0xf8] sm:$0xff] }
  0xef   : > { %v891_v26 = vpack.c.bf16 %v886_v22, %v885_v21  ;;  %v3127_v21 = vld [vmem:[%s3856_s5 + $0x78] sm:$0xff] }
  0xf0   : > { %793 = vmatmul.bf16.gmra.mxu3 %v708_v23  ;;  %875 = vmatmul.bf16.gmra.mxu0 %v669_v25 }
  0xf1   : > { %976 = vmatmul.bf16.gmra.mxu1 %v891_v26  ;;  %1824 = vmatpush.bf16.msrb.mxu0 %v3127_v21 }
  0xf5   : > { %v704_v30 = vld [vmem:[#allocation2 + $0x31] sm:$0xff]  ;;  %v705_v31 = vld [vmem:[#allocation2 + $0x39] sm:$0xff] }
  0xf6   : > { %v887_v32 = vld [vmem:[#allocation2 + $0x32] sm:$0xff]  ;;  %v888_v33 = vld [vmem:[#allocation2 + $0x3a] sm:$0xff]  ;;  %v709_v34 = vpack.c.bf16 %v705_v31, %v704_v30  ;;  %v1119_v45 = vpack.c.bf16 %v704_v30, %v703_v19  ;;  %v1120_v50 = vpack.c.bf16 %v1116_v48, %v705_v31 }
  0xf7   : > { %v892_v36 = vpack.c.bf16 %v888_v33, %v887_v32  ;;  %v1233_v13 = vpack.c.bf16 %v887_v32, %v886_v22  ;;  %v1234_v46 = vpack.c.bf16 %v1230_v44, %v888_v33  ;;  %v3135_v19 = vld [vmem:[%s3856_s5 + $0xb8] sm:$0xff]  ;;  %v3118_v30 = vld [vmem:[%s3856_s5 + $0x30] sm:$0xff]  ;;  %v3133_v33 = vld [vmem:[%s3856_s5 + $0xa8] sm:$0xff] }
  0xf8   : > { %1095 = vmatmul.bf16.gmra.mxu2 %v1006_v29  ;;  %v3126_v29 = vld [vmem:[%s3856_s5 + $0x70] sm:$0xff]  ;;  %v3131_v48 = vld [vmem:[%s3856_s5 + $0x98] sm:$0xff] }
  0xf9   : > { %2007 = vmatpush.bf16.msrb.mxu2 %v3135_v19  ;;  %1825 = vmatpush.bf16.msrb.mxu0 %v3126_v29  ;;  %v3139_v19 = vld [vmem:[%s3856_s5 + $0xd8] sm:$0xff] }
  0xfd   : > { %1826 = vmatpush.bf16.msrb.mxu0 %v3125_v37  ;;  %v3121_v37 = vld [vmem:[%s3856_s5 + $0x48] sm:$0xff] }
 0x100   : > { %798 = vmatmul.bf16.gmra.mxu3 %v709_v34  ;;  %1308 = vmatmul.bf16.vlgmr.msra.gmra.mxu0 %v1231_v35  ;;  %v3117_v35 = vld [vmem:[%s3856_s5 + $0x28] sm:$0xff] }
 0x101   : > { %981 = vmatmul.bf16.gmra.mxu1 %v892_v36 }
 0x108   : > { %1536 = vmatmul.bf16.vlgmr.msra.gmra.mxu2 %v3522_v57 }
 0x110   : > { %1194 = vmatmul.bf16.vlgmr.msrb.gmra.mxu3 %v1117_v39  ;;  %1313 = vmatmul.bf16.gmra.mxu0 %v1232_v16  ;;  %v3116_v39 = vld [vmem:[%s3856_s5 + $0x20] sm:$0xff] }
 0x111   : > { %1422 = vmatmul.bf16.vlgmr.msra.gmra.mxu1 %v3464_v18  ;;  %v3105_v18 = vld [vmem:[%s3854_s3 + $0x208] sm:$0xff] }
 0x112   : > { %1648 = vmatpush.bf16.msra.mxu3 %v3105_v18  ;;  %v3114_v18 = vld [vmem:[%s3856_s5 + $0x10] sm:$0xff] }
 0x116   : > { %1649 = vmatpush.bf16.msra.mxu3 %v3104_v43 }
 0x118   : > { %1541 = vmatmul.bf16.gmra.mxu2 %v708_v23  ;;  %v3119_v23 = vld [vmem:[%s3856_s5 + $0x38] sm:$0xff] }
 0x119   : > { %1901 = vmatpush.bf16.msrb.mxu1 %v3119_v23 }
 0x11a   : > { %2121 = vmatpush.bf16.msrb.mxu3 %v3143_v20  ;;  %v3123_v20 = vld [vmem:[%s3856_s5 + $0x58] sm:$0xff] }
 0x11d   : > { %1902 = vmatpush.bf16.msrb.mxu1 %v3118_v30 }
 0x120   : > { %1199 = vmatmul.bf16.gmra.mxu3 %v1118_v42  ;;  %1318 = vmatmul.bf16.gmra.mxu0 %v1233_v13  ;;  %v3132_v13 = vld [vmem:[%s3856_s5 + $0xa0] sm:$0xff] }
 0x121   : > { %1427 = vmatmul.bf16.gmra.mxu1 %v3524_v58 }
 0x122   : > { %1903 = vmatpush.bf16.msrb.mxu1 %v3117_v35 }
 0x126   : > { %1904 = vmatpush.bf16.msrb.mxu1 %v3116_v39 }
 0x128   : > { %1546 = vmatmul.bf16.gmra.mxu2 %v709_v34  ;;  %v3141_v34 = vld [vmem:[%s3856_s5 + $0xe8] sm:$0xff] }
 0x12a   : > { %1905 = vmatpush.bf16.msrb.mxu1 %v3115_v41 }
 0x12e   : > { %1906 = vmatpush.bf16.msrb.mxu1 %v3114_v18 }
 0x130   : > { %1204 = vmatmul.bf16.gmra.mxu3 %v1119_v45  ;;  %1323 = vmatmul.bf16.gmra.mxu0 %v1234_v46  ;;  %v3140_v45 = vld [vmem:[%s3856_s5 + $0xe0] sm:$0xff] }
 0x131   : > { %1432 = vmatmul.bf16.gmra.mxu1 %v669_v25  ;;  %v3134_v25 = vld [vmem:[%s3856_s5 + $0xb0] sm:$0xff]  ;;  %v3124_v46 = vld [vmem:[%s3856_s5 + $0x60] sm:$0xff] }
 0x132   : > { %2008 = vmatpush.bf16.msrb.mxu2 %v3134_v25  ;;  %1827 = vmatpush.bf16.msrb.mxu0 %v3124_v46  ;;  %v3129_v25 = vld [vmem:[%s3856_s5 + $0x88] sm:$0xff] }
 0x136   : > { %2009 = vmatpush.bf16.msrb.mxu2 %v3133_v33  ;;  %1828 = vmatpush.bf16.msrb.mxu0 %v3123_v20  ;;  %v3136_v20 = vld [vmem:[%s3856_s5 + $0xc0] sm:$0xff] }
 0x138   : > { %1551 = vmatmul.bf16.gmra.mxu2 %v1462_v49  ;;  %v3113_v49 = vld [vmem:[%s3856_s5 + $0x8] sm:$0xff] }
 0x139   : > { %1907 = vmatpush.bf16.msrb.mxu1 %v3113_v49 }
 0x13a   : > { %2010 = vmatpush.bf16.msrb.mxu2 %v3132_v13 }
 0x13d   : > { %v3598_v55 = vpop.f32.mrf.mxu0  ;;  %1908 = vmatpush.bf16.msrb.mxu1 %v3112_v62 }
 0x13e   : > { %2011 = vmatpush.bf16.msrb.mxu2 %v3131_v48 }
 0x140   : > { %1209 = vmatmul.bf16.gmra.mxu3 %v1120_v50 }
 0x141   : > { %1437 = vmatmul.bf16.gmra.mxu1 %v3166_v51 }
 0x145   : > { %v3608_v61 = vpop.f32.mrf.mxu0 }
 0x14b   : > { %v3604_v58 = vpop.f32.mrf.mxu2 }
 0x14d   : > { %v3616_v2 = vpop.f32.mrf.mxu0 }
 0x14e   : > { %v3602_v57 = vpop.f32.mrf.mxu1 }
 0x150   : > { %1650 = vmatmul.bf16.vlgmr.msra.gmra.mxu3 %v3528_v59 }
 0x153   : > { %v3592_v52 = vpop.f32.mrf.mxu3  ;;  %v3614_v1 = vpop.f32.mrf.mxu2 }
 0x154   : > { %v862_v47 = vadd.f32 %v3598_v55, %v3592_v52  ;;  %v3130_v52 = vld [vmem:[%s3856_s5 + $0x90] sm:$0xff] }
 0x155   : > { %v3624_v6 = vpop.f32.mrf.mxu0  ;;  %2012 = vmatpush.bf16.msrb.mxu2 %v3130_v52 }
 0x156   : > { %v3610_v59 = vpop.f32.mrf.mxu1  ;;  %v987_v51 = vadd.f32 %v3602_v57, %v862_v47 }
 0x158   : > { %v1101_v57 = vadd.f32 %v3604_v58, %v987_v51  ;;  %v3122_v58 = vld [vmem:[%s3856_s5 + $0x50] sm:$0xff] }
 0x159   : > { %2013 = vmatpush.bf16.msrb.mxu2 %v3129_v25  ;;  %1829 = vmatpush.bf16.msrb.mxu0 %v3122_v58 }
 0x15b   : > { %v3594_v53 = vpop.f32.mrf.mxu3  ;;  %v3622_v5 = vpop.f32.mrf.mxu2 }
 0x15c   : > { %v864_v21 = vadd.f32 %v3608_v61, %v3594_v53  ;;  %v3128_v53 = vld [vmem:[%s3856_s5 + $0x80] sm:$0xff] }
 0x15d   : > { %v3632_v10 = vpop.f32.mrf.mxu0  ;;  %2014 = vmatpush.bf16.msrb.mxu2 %v3128_v53  ;;  %1830 = vmatpush.bf16.msrb.mxu0 %v3121_v37 }
 0x15e   : > { %v3618_v3 = vpop.f32.mrf.mxu1  ;;  %v988_v29 = vadd.f32 %v3610_v59, %v864_v21 }
 0x160   : > { %1655 = vmatmul.bf16.gmra.mxu3 %v891_v26  ;;  %v3142_v26 = vld [vmem:[%s3856_s5 + $0xf0] sm:$0xff]  ;;  %v1102_v59 = vadd.f32 %v3614_v1, %v988_v29  ;;  %v3137_v1 = vld [vmem:[%s3856_s5 + $0xc8] sm:$0xff] }
 0x161   : > { %2122 = vmatpush.bf16.msrb.mxu3 %v3142_v26 }
 0x163   : > { %v3596_v54 = vpop.f32.mrf.mxu3  ;;  %v3630_v9 = vpop.f32.mrf.mxu2 }
 0x165   : > { %v3642_v15 = vpop.f32.mrf.mxu0  ;;  %2123 = vmatpush.bf16.msrb.mxu3 %v3141_v34  ;;  %v3138_v34 = vld [vmem:[%s3856_s5 + $0xd0] sm:$0xff] }
 0x166   : > { %v3628_v8 = vpop.f32.mrf.mxu1 }
 0x169   : > { %2124 = vmatpush.bf16.msrb.mxu3 %v3140_v45  ;;  %v3781_v45 = vld [vmem:[%s3855_s4] ss:$0 sm:$0xff] }
 0x16b   : > { %v3600_v56 = vpop.f32.mrf.mxu3  ;;  %v3638_v12 = vpop.f32.mrf.mxu2 }
 0x16c   : > { %v869_v47 = vadd.f32 %v3624_v6, %v3600_v56 }
 0x16d   : > { %v3668_v28 = vpop.f32.mrf.mxu0  ;;  %2125 = vmatpush.bf16.msrb.mxu3 %v3139_v19 }
 0x16e   : > { %v3636_v11 = vpop.f32.mrf.mxu1  ;;  %v990_v52 = vadd.f32 %v3628_v8, %v869_v47 }
 0x170   : > { %1660 = vmatmul.bf16.gmra.mxu3 %v892_v36  ;;  %v1104_v6 = vadd.f32 %v3630_v9, %v990_v52 }
 0x171   : > { %2126 = vmatpush.bf16.msrb.mxu3 %v3138_v34 }
 0x173   : > { %v3606_v60 = vpop.f32.mrf.mxu3  ;;  %v3666_v27 = vpop.f32.mrf.mxu2 }
 0x175   : > { %v3694_v38 = vpop.f32.mrf.mxu0  ;;  %2127 = vmatpush.bf16.msrb.mxu3 %v3137_v1 }
 0x176   : > { %v3644_v17 = vpop.f32.mrf.mxu1 }
 0x179   : > { %2128 = vmatpush.bf16.msrb.mxu3 %v3136_v20 }
 0x17b   : > { %v3612_v63 = vpop.f32.mrf.mxu3  ;;  %v3689_v36 = vpop.f32.mrf.mxu2 }
 0x17d   : > { %v1309_v43 = vpop.f32.mrf.mxu0 }
 0x17e   : > { %v3676_v31 = vpop.f32.mrf.mxu1 }
 0x180   : > { %1665 = vmatmul.bf16.gmra.mxu3 %v1576_v0 }
 0x183   : > { %v3620_v4 = vpop.f32.mrf.mxu3  ;;  %v3706_v42 = vpop.f32.mrf.mxu2 }
 0x185   : > { %v1311_v23 = vpop.f32.mrf.mxu0 }
 0x186   : > { %v3701_v40 = vpop.f32.mrf.mxu1 }
 0x18b   : > { %v3626_v7 = vpop.f32.mrf.mxu3  ;;  %v1537_v55 = vpop.f32.mrf.mxu2 }
 0x18d   : > { %v1314_v13 = vpop.f32.mrf.mxu0 }
 0x18e   : > { %v1423_v50 = vpop.f32.mrf.mxu1 }
 0x193   : > { %v3634_v24 = vpop.f32.mrf.mxu3  ;;  %v1539_v35 = vpop.f32.mrf.mxu2 }
 0x194   : > { %v1215_v26 = vadd.f32 %v3634_v24, %v1101_v57  ;;  %v867_v24 = vadd.f32 %v3616_v2, %v3596_v54  ;;  %v3120_v54 = vld [vmem:[%s3856_s5 + $0x40] sm:$0xff] }
 0x195   : > { %1831 = vmatpush.bf16.msrb.mxu0 %v3120_v54  ;;  %v1316_v19 = vpop.f32.mrf.mxu0 }
 0x196   : > { %v1425_v30 = vpop.f32.mrf.mxu1  ;;  %v1329_v61 = vadd.f32 %v1309_v43, %v1215_v26  ;;  %v989_v18 = vadd.f32 %v3618_v3, %v867_v24 }
 0x198   : > { %v1443_v39 = vadd.f32 %v1423_v50, %v1329_v61  ;;  %v1103_v3 = vadd.f32 %v3622_v5, %v989_v18 }
 0x19a   : > { %v1557_v2 = vadd.f32 %v1537_v55, %v1443_v39 }
 0x19b   : > { %v3640_v14 = vpop.f32.mrf.mxu3  ;;  %v1542_v62 = vpop.f32.mrf.mxu2 }
 0x19c   : > { %v1216_v41 = vadd.f32 %v3640_v14, %v1102_v59 }
 0x19d   : > { %v1319_v24 = vpop.f32.mrf.mxu0 }
 0x19e   : > { %v1330_v43 = vadd.f32 %v1311_v23, %v1216_v41  ;;  %v1428_v14 = vpop.f32.mrf.mxu1 }
 0x1a0   : > { %v1444_v49 = vadd.f32 %v1425_v30, %v1330_v43 }
 0x1a2   : > { %v1558_v5 = vadd.f32 %v1539_v35, %v1444_v49 }
 0x1a3   : > { %v3655_v22 = vpop.f32.mrf.mxu3  ;;  %v1544_v53 = vpop.f32.mrf.mxu2 }
 0x1a4   : > { %v1217_v50 = vadd.f32 %v3655_v22, %v1103_v3  ;;  %v872_v22 = vadd.f32 %v3632_v10, %v3606_v60  ;;  %v874_v10 = vadd.f32 %v3642_v15, %v3612_v63  ;;  %v877_v15 = vadd.f32 %v3668_v28, %v3620_v4 }
 0x1a6   : > { %v1331_v57 = vadd.f32 %v1314_v13, %v1217_v50  ;;  %v1430_v8 = vpop.f32.mrf.mxu1  ;;  %v991_v30 = vadd.f32 %v3636_v11, %v872_v22  ;;  %v992_v13 = vadd.f32 %v3644_v17, %v874_v10 }
 0x1a8   : > { %v1445_v25 = vadd.f32 %v1428_v14, %v1331_v57  ;;  %v1105_v60 = vadd.f32 %v3638_v12, %v991_v30  ;;  %v1106_v63 = vadd.f32 %v3666_v27, %v992_v13 }
 0x1aa   : > { %v1559_v61 = vadd.f32 %v1542_v62, %v1445_v25 }
 0x1ab   : > { %v3678_v32 = vpop.f32.mrf.mxu3  ;;  %v1547_v43 = vpop.f32.mrf.mxu2 }
 0x1ac   : > { %v1218_v26 = vadd.f32 %v3678_v32, %v1104_v6 }
 0x1ae   : > { %v1332_v34 = vadd.f32 %v1316_v19, %v1218_v26  ;;  %v1433_v41 = vpop.f32.mrf.mxu1 }
 0x1b0   : > { %v1446_v37 = vadd.f32 %v1430_v8, %v1332_v34 }
 0x1b2   : > { %v1560_v1 = vadd.f32 %v1544_v53, %v1446_v37 }
 0x1b3   : > { %v3699_v16 = vpop.f32.mrf.mxu3  ;;  %v1549_v57 = vpop.f32.mrf.mxu2 }
 0x1b4   : > { %v1219_v11 = vadd.f32 %v3699_v16, %v1105_v60 }
 0x1b6   : > { %v1333_v54 = vadd.f32 %v1319_v24, %v1219_v11  ;;  %v1435_v50 = vpop.f32.mrf.mxu1 }
 0x1b8   : > { %v1447_v3 = vadd.f32 %v1433_v41, %v1333_v54 }
 0x1bb   : > { %v3714_v44 = vpop.f32.mrf.mxu3 }
 0x1bc   : > { %v1220_v17 = vadd.f32 %v3714_v44, %v1106_v63  ;;  %v879_v44 = vadd.f32 %v3694_v38, %v3626_v7 }
 0x1be   : > { %v994_v22 = vadd.f32 %v3701_v40, %v879_v44  ;;  %v1438_v8 = vpop.f32.mrf.mxu1 }
 0x1c3   : > { %v3737_v0 = vpop.f32.mrf.mxu3 }
 0x1cb   : > { %v3759_v33 = vpop.f32.mrf.mxu3 }
 0x1d3   : > { %v1651_v46 = vpop.f32.mrf.mxu3 }
 0x1d4   : > { %v1671_v48 = vadd.f32 %v1651_v46, %v1557_v2  ;;  %v1321_v46 = vpop.f32.mrf.mxu0 }
 0x1d5   : > { %v1334_v62 = vadd.f32 %v1321_v46, %v1220_v17 }
 0x1d6   : > { %v1683_v51 = vadd.f32 %v3781_v45, %v1671_v48  ;;  %v993_v48 = vadd.f32 %v3676_v31, %v877_v15 }
 0x1d7   : > { %v1448_v31 = vadd.f32 %v1435_v50, %v1334_v62 }
 0x1d8   : > { %vm1691_vm8 = vcmp.ge.f32.partialorder %v1683_v51, 0.0  ;;  %v1699_v55 = vmul.f32 0.2, %v1683_v51  ;;  %v1107_v20 = vadd.f32 %v3689_v36, %v993_v48 }
 0x1d9   : > { %v1562_v25 = vadd.f32 %v1549_v57, %v1448_v31  ;;  %v3824_v57 = vld [vmem:[%s3857_s6] ss:$0 sm:$0xff] }
 0x1da   : > { %v1707_v21 = vsel %vm1691_vm8, %v1683_v51, %v1699_v55  ;;  %v1561_v51 = vadd.f32 %v1547_v43, %v1447_v3 }
 0x1db   : > { %1723 = vst [vmem:[#allocation3] sm:$0xff] %v1707_v21  ;;  %v1653_v56 = vpop.f32.mrf.mxu3 }
 0x1dc   : > { %v1672_v23 = vadd.f32 %v1653_v56, %v1558_v5  ;;  %v1324_v6 = vpop.f32.mrf.mxu0 }
 0x1de   : > { %v1684_v29 = vadd.f32 %v3781_v45, %v1672_v23 }
 0x1e0   : > { %vm1692_vm9 = vcmp.ge.f32.partialorder %v1684_v29, 0.0  ;;  %v1700_v58 = vmul.f32 0.2, %v1684_v29 }
 0x1e2   : > { %v1708_v59 = vsel %vm1692_vm9, %v1684_v29, %v1700_v58  ;;  %v1108_v58 = vadd.f32 %v3706_v42, %v994_v22 }
 0x1e3   : > { %v1715_v9 = vpack.c.bf16 %v1708_v59, %v1707_v21  ;;  %1724 = vst [vmem:[#allocation3 + $0x8] sm:$0xff] %v1708_v59  ;;  %v1656_v35 = vpop.f32.mrf.mxu3  ;;  %v1221_v21 = vadd.f32 %v3737_v0, %v1107_v20  ;;  %v1552_v0 = vpop.f32.mrf.mxu2 }
 0x1e4   : > { %v1673_v32 = vadd.f32 %v1656_v35, %v1559_v61  ;;  %v1222_v40 = vadd.f32 %v3759_v33, %v1108_v58  ;;  %v1326_v24 = vpop.f32.mrf.mxu0 }
 0x1e5   : > { %1909 = vmatmul.bf16.vlgmr.msrb.gmra.mxu1 %v1715_v9  ;;  %v1335_v36 = vadd.f32 %v1324_v6, %v1221_v21 }
 0x1e6   : > { %v1685_v39 = vadd.f32 %v3781_v45, %v1673_v32  ;;  %v1336_v35 = vadd.f32 %v1326_v24, %v1222_v40  ;;  %v1440_v32 = vpop.f32.mrf.mxu1 }
 0x1e7   : > { %v1449_v61 = vadd.f32 %v1438_v8, %v1335_v36 }
 0x1e8   : > { %vm1693_vm10 = vcmp.ge.f32.partialorder %v1685_v39, 0.0  ;;  %v1701_v18 = vmul.f32 0.2, %v1685_v39  ;;  %v1450_v41 = vadd.f32 %v1440_v32, %v1336_v35 }
 0x1e9   : > { %v1563_v9 = vadd.f32 %v1552_v0, %v1449_v61 }
 0x1ea   : > { %v1709_v2 = vsel %vm1693_vm10, %v1685_v39, %v1701_v18  ;;  %v1747_v52 = vld [vmem:[#allocation3 + $0x1] sm:$0xff] }
 0x1eb   : > { %1725 = vst [vmem:[#allocation3 + $0x10] sm:$0xff] %v1709_v2  ;;  %v1658_v12 = vpop.f32.mrf.mxu3  ;;  %v1938_v14 = vpack.c.bf16 %v1709_v2, %v1708_v59  ;;  %v1554_v13 = vpop.f32.mrf.mxu2 }
 0x1ec   : > { %v1674_v16 = vadd.f32 %v1658_v12, %v1560_v1  ;;  %v1564_v1 = vadd.f32 %v1554_v13, %v1450_v41 }
 0x1ed   : > { %2015 = vmatmul.bf16.vlgmr.msrb.gmra.mxu2 %v1938_v14 }
 0x1ee   : > { %v1686_v47 = vadd.f32 %v3781_v45, %v1674_v16 }
 0x1f0   : > { %vm1694_vm11 = vcmp.ge.f32.partialorder %v1686_v47, 0.0  ;;  %v1702_v49 = vmul.f32 0.2, %v1686_v47 }
 0x1f2   : > { %v1748_v27 = vld [vmem:[#allocation3 + $0x9] sm:$0xff]  ;;  %v1710_v55 = vsel %vm1694_vm11, %v1686_v47, %v1702_v49 }
 0x1f3   : > { %v1661_v19 = vpop.f32.mrf.mxu3  ;;  %v1755_v4 = vpack.c.bf16 %v1748_v27, %v1747_v52  ;;  %v1716_v28 = vpack.c.bf16 %v1710_v55, %v1709_v2  ;;  %1726 = vst [vmem:[#allocation3 + $0x18] sm:$0xff] %v1710_v55  ;;  %v2051_v52 = vld [vmem:[#allocation3 + $0x41] sm:$0xff] }
 0x1f4   : > { %v1675_v5 = vadd.f32 %v1661_v19, %v1561_v51 }
 0x1f5   : > { %1832 = vmatmul.bf16.vlgmr.msrb.gmra.mxu0 %v1755_v4  ;;  %1914 = vmatmul.bf16.gmra.mxu1 %v1716_v28 }
 0x1f6   : > { %v1687_v56 = vadd.f32 %v3781_v45, %v1675_v5 }
 0x1f8   : > { %vm1695_vm12 = vcmp.ge.f32.partialorder %v1687_v56, 0.0  ;;  %v1703_v23 = vmul.f32 0.2, %v1687_v56 }
 0x1fa   : > { %v1711_v26 = vsel %vm1695_vm12, %v1687_v56, %v1703_v23  ;;  %v2045_v29 = vld [vmem:[#allocation3 + $0x11] sm:$0xff] }
 0x1fb   : > { %1727 = vst [vmem:[#allocation3 + $0x20] sm:$0xff] %v1711_v26  ;;  %v1663_v7 = vpop.f32.mrf.mxu3  ;;  %v2052_v38 = vpack.c.bf16 %v2045_v29, %v1748_v27  ;;  %v1939_v30 = vpack.c.bf16 %v1711_v26, %v1710_v55 }
 0x1fc   : > { %v1676_v53 = vadd.f32 %v1663_v7, %v1562_v25 }
 0x1fd   : > { %2129 = vmatmul.bf16.vlgmr.msrb.gmra.mxu3 %v2052_v38  ;;  %2020 = vmatmul.bf16.gmra.mxu2 %v1939_v30 }
 0x1fe   : > { %v1688_v34 = vadd.f32 %v3781_v45, %v1676_v53 }
 0x200   : > { %vm1696_vm13 = vcmp.ge.f32.partialorder %v1688_v34, 0.0  ;;  %v1704_v59 = vmul.f32 0.2, %v1688_v34 }
 0x202   : > { %v1750_v60 = vld [vmem:[#allocation3 + $0x19] sm:$0xff]  ;;  %v1712_v10 = vsel %vm1696_vm13, %v1688_v34, %v1704_v59 }
 0x203   : > { %v1666_v37 = vpop.f32.mrf.mxu3  ;;  %v1756_v11 = vpack.c.bf16 %v1750_v60, %v2045_v29  ;;  %v1717_v42 = vpack.c.bf16 %v1712_v10, %v1711_v26  ;;  %1728 = vst [vmem:[#allocation3 + $0x28] sm:$0xff] %v1712_v10 }
 0x204   : > { %v1677_v39 = vadd.f32 %v1666_v37, %v1563_v9 }
 0x205   : > { %1837 = vmatmul.bf16.gmra.mxu0 %v1756_v11  ;;  %1919 = vmatmul.bf16.gmra.mxu1 %v1717_v42 }
 0x206   : > { %v1689_v33 = vadd.f32 %v3781_v45, %v1677_v39 }
 0x208   : > { %vm1697_vm14 = vcmp.ge.f32.partialorder %v1689_v33, 0.0  ;;  %v1705_v18 = vmul.f32 0.2, %v1689_v33 }
 0x20a   : > { %v1713_v54 = vsel %vm1697_vm14, %v1689_v33, %v1705_v18  ;;  %v2047_v2 = vld [vmem:[#allocation3 + $0x21] sm:$0xff] }
 0x20b   : > { %1729 = vst [vmem:[#allocation3 + $0x30] sm:$0xff] %v1713_v54  ;;  %v1668_v43 = vpop.f32.mrf.mxu3  ;;  %v2053_v12 = vpack.c.bf16 %v2047_v2, %v1750_v60  ;;  %v1940_v14 = vpack.c.bf16 %v1713_v54, %v1712_v10 }
 0x20c   : > { %v1678_v63 = vadd.f32 %v1668_v43, %v1564_v1 }
 0x20d   : > { %2134 = vmatmul.bf16.gmra.mxu3 %v2053_v12  ;;  %2025 = vmatmul.bf16.gmra.mxu2 %v1940_v14 }
 0x20e   : > { %v1690_v15 = vadd.f32 %v3781_v45, %v1678_v63 }
 0x210   : > { %vm1698_vm15 = vcmp.ge.f32.partialorder %v1690_v15, 0.0  ;;  %v1706_v16 = vmul.f32 0.2, %v1690_v15 }
 0x212   : > { %v1752_v46 = vld [vmem:[#allocation3 + $0x29] sm:$0xff]  ;;  %v1714_v3 = vsel %vm1698_vm15, %v1690_v15, %v1706_v16 }
 0x213   : > { %v1757_v17 = vpack.c.bf16 %v1752_v46, %v2047_v2  ;;  %v1718_v47 = vpack.c.bf16 %v1714_v3, %v1713_v54  ;;  %1730 = vst [vmem:[#allocation3 + $0x38] sm:$0xff] %v1714_v3  ;;  %v1941_v50 = vpack.c.bf16 0.0, %v1714_v3 }
 0x215   : > { %1842 = vmatmul.bf16.gmra.mxu0 %v1757_v17  ;;  %1924 = vmatmul.bf16.gmra.mxu1 %v1718_v47 }
 0x21a   : > { %v2049_v48 = vld [vmem:[#allocation3 + $0x31] sm:$0xff]  ;;  %v1754_v51 = vld [vmem:[#allocation3 + $0x39] sm:$0xff] }
 0x21b   : > { %v2054_v49 = vpack.c.bf16 %v2049_v48, %v1752_v46  ;;  %v1758_v62 = vpack.c.bf16 %v1754_v51, %v2049_v48  ;;  %v2055_v45 = vpack.c.bf16 %v2051_v52, %v1754_v51 }
 0x21d   : > { %2139 = vmatmul.bf16.gmra.mxu3 %v2054_v49  ;;  %2030 = vmatmul.bf16.gmra.mxu2 %v1941_v50 }
 0x225   : > { %1847 = vmatmul.bf16.gmra.mxu0 %v1758_v62 }
 0x22d   : > { %2144 = vmatmul.bf16.gmra.mxu3 %v2055_v45 }
 0x262   : > { %v1910_v27 = vpop.f32.mrf.mxu1 }
 0x26a   : > { %v1912_v4 = vpop.f32.mrf.mxu1 }
 0x270   : > { %v2016_v55 = vpop.f32.mrf.mxu2 }
 0x272   : > { %v1833_v19 = vpop.f32.mrf.mxu0  ;;  %v1915_v31 = vpop.f32.mrf.mxu1 }
 0x273   : > { %v1911_v44 = vadd.f32 %v1910_v27, %v1833_v19 }
 0x275   : > { %v2036_v5 = vadd.f32 %v2016_v55, %v1911_v44 }
 0x278   : > { %v2018_v20 = vpop.f32.mrf.mxu2 }
 0x27a   : > { %v1835_v28 = vpop.f32.mrf.mxu0  ;;  %v1917_v38 = vpop.f32.mrf.mxu1 }
 0x27b   : > { %v1913_v22 = vadd.f32 %v1912_v4, %v1835_v28 }
 0x27d   : > { %v2037_v36 = vadd.f32 %v2018_v20, %v1913_v22 }
 0x280   : > { %v2130_v21 = vpop.f32.mrf.mxu3  ;;  %v2021_v8 = vpop.f32.mrf.mxu2 }
 0x281   : > { %v2150_v56 = vadd.f32 %v2130_v21, %v2036_v5 }
 0x282   : > { %v1838_v6 = vpop.f32.mrf.mxu0  ;;  %v1920_v10 = vpop.f32.mrf.mxu1 }
 0x283   : > { %v2162_v23 = vadd.f32 %v3824_v57, %v2150_v56  ;;  %v1916_v58 = vadd.f32 %v1915_v31, %v1838_v6 }
 0x285   : > { %vm2170_vm0 = vcmp.ge.f32.partialorder %v2162_v23, 0.0  ;;  %v2178_v25 = vmul.f32 0.2, %v2162_v23  ;;  %v2038_v40 = vadd.f32 %v2021_v8, %v1916_v58 }
 0x287   : > { %v2186_v26 = vsel %vm2170_vm0, %v2162_v23, %v2178_v25 }
 0x288   : > { %2194 = vst [vmem:[%s3831_s20] sm:$0xff] %v2186_v26  ;;  %v2132_v29 = vpop.f32.mrf.mxu3  ;;  %v2023_v61 = vpop.f32.mrf.mxu2 }
 0x289   : > { %v2151_v7 = vadd.f32 %v2132_v29, %v2037_v36 }
 0x28a   : > { %v1840_v30 = vpop.f32.mrf.mxu0  ;;  %v1922_v54 = vpop.f32.mrf.mxu1 }
 0x28b   : > { %v2163_v53 = vadd.f32 %v3824_v57, %v2151_v7  ;;  %v1918_v35 = vadd.f32 %v1917_v38, %v1840_v30 }
 0x28d   : > { %vm2171_vm1 = vcmp.ge.f32.partialorder %v2163_v53, 0.0  ;;  %v2179_v0 = vmul.f32 0.2, %v2163_v53  ;;  %v2039_v37 = vadd.f32 %v2023_v61, %v1918_v35 }
 0x28f   : > { %v2187_v34 = vsel %vm2171_vm1, %v2163_v53, %v2179_v0 }
 0x290   : > { %2195 = vst [vmem:[%s3831_s20 + $0x8] sm:$0xff] %v2187_v34  ;;  %v2135_v59 = vpop.f32.mrf.mxu3  ;;  %v2026_v42 = vpop.f32.mrf.mxu2 }
 0x291   : > { %v2152_v24 = vadd.f32 %v2135_v59, %v2038_v40 }
 0x292   : > { %v1843_v9 = vpop.f32.mrf.mxu0  ;;  %v1925_v48 = vpop.f32.mrf.mxu1 }
 0x293   : > { %v2164_v60 = vadd.f32 %v3824_v57, %v2152_v24  ;;  %v1921_v33 = vadd.f32 %v1920_v10, %v1843_v9 }
 0x295   : > { %vm2172_vm2 = vcmp.ge.f32.partialorder %v2164_v60, 0.0  ;;  %v2180_v32 = vmul.f32 0.2, %v2164_v60  ;;  %v2040_v2 = vadd.f32 %v2026_v42, %v1921_v33 }
 0x297   : > { %v2188_v11 = vsel %vm2172_vm2, %v2164_v60, %v2180_v32 }
 0x298   : > { %2196 = vst [vmem:[%s3831_s20 + $0x10] sm:$0xff] %v2188_v11  ;;  %v2137_v39 = vpop.f32.mrf.mxu3  ;;  %v2028_v63 = vpop.f32.mrf.mxu2 }
 0x299   : > { %v2153_v41 = vadd.f32 %v2137_v39, %v2039_v37 }
 0x29a   : > { %v1845_v18 = vpop.f32.mrf.mxu0  ;;  %v1927_v20 = vpop.f32.mrf.mxu1 }
 0x29b   : > { %v2165_v13 = vadd.f32 %v3824_v57, %v2153_v41  ;;  %v1923_v15 = vadd.f32 %v1922_v54, %v1845_v18 }
 0x29d   : > { %vm2173_vm3 = vcmp.ge.f32.partialorder %v2165_v13, 0.0  ;;  %v2181_v1 = vmul.f32 0.2, %v2165_v13  ;;  %v2041_v17 = vadd.f32 %v2028_v63, %v1923_v15 }
 0x29f   : > { %v2189_v43 = vsel %vm2173_vm3, %v2165_v13, %v2181_v1 }
 0x2a0   : > { %2197 = vst [vmem:[%s3831_s20 + $0x18] sm:$0xff] %v2189_v43  ;;  %v2140_v12 = vpop.f32.mrf.mxu3  ;;  %v2031_v52 = vpop.f32.mrf.mxu2 }
 0x2a1   : > { %v2154_v14 = vadd.f32 %v2140_v12, %v2040_v2 }
 0x2a2   : > { %v1848_v3 = vpop.f32.mrf.mxu0 }
 0x2a3   : > { %v2166_v16 = vadd.f32 %v3824_v57, %v2154_v14  ;;  %v1926_v51 = vadd.f32 %v1925_v48, %v1848_v3 }
 0x2a5   : > { %vm2174_vm4 = vcmp.ge.f32.partialorder %v2166_v16, 0.0  ;;  %v2182_v46 = vmul.f32 0.2, %v2166_v16  ;;  %v2042_v27 = vadd.f32 %v2031_v52, %v1926_v51 }
 0x2a7   : > { %v2190_v47 = vsel %vm2174_vm4, %v2166_v16, %v2182_v46 }
 0x2a8   : > { %2198 = vst [vmem:[%s3831_s20 + $0x20] sm:$0xff] %v2190_v47  ;;  %v2142_v49 = vpop.f32.mrf.mxu3  ;;  %v2033_v21 = vpop.f32.mrf.mxu2 }
 0x2a9   : > { %v2155_v50 = vadd.f32 %v2142_v49, %v2041_v17 }
 0x2aa   : > { %v1850_v19 = vpop.f32.mrf.mxu0 }
 0x2ab   : > { %v2167_v62 = vadd.f32 %v3824_v57, %v2155_v50  ;;  %v1928_v44 = vadd.f32 %v1927_v20, %v1850_v19 }
 0x2ad   : > { %vm2175_vm5 = vcmp.ge.f32.partialorder %v2167_v62, 0.0  ;;  %v2183_v45 = vmul.f32 0.2, %v2167_v62  ;;  %v2043_v56 = vadd.f32 %v2033_v21, %v1928_v44 }
 0x2af   : > { %v2191_v55 = vsel %vm2175_vm5, %v2167_v62, %v2183_v45 }
 0x2b0   : > { %2199 = vst [vmem:[%s3831_s20 + $0x28] sm:$0xff] %v2191_v55  ;;  %v2145_v4 = vpop.f32.mrf.mxu3 }
 0x2b1   : > { %v2156_v28 = vadd.f32 %v2145_v4, %v2042_v27 }
 0x2b3   : > { %v2168_v5 = vadd.f32 %v3824_v57, %v2156_v28 }
 0x2b5   : > { %vm2176_vm6 = vcmp.ge.f32.partialorder %v2168_v5, 0.0  ;;  %v2184_v31 = vmul.f32 0.2, %v2168_v5 }
 0x2b7   : > { %v2192_v6 = vsel %vm2176_vm6, %v2168_v5, %v2184_v31 }
 0x2b8   : > { %2200 = vst [vmem:[%s3831_s20 + $0x30] sm:$0xff] %v2192_v6  ;;  %v2147_v22 = vpop.f32.mrf.mxu3 }
 0x2b9   : > { %v2157_v23 = vadd.f32 %v2147_v22, %v2043_v56 }
 0x2bb   : > { %v2169_v8 = vadd.f32 %v3824_v57, %v2157_v23 }
 0x2bd   : > { %vm2177_vm7 = vcmp.ge.f32.partialorder %v2169_v8, 0.0  ;;  %v2185_v25 = vmul.f32 0.2, %v2169_v8 }
 0x2bf   : > { %v2193_v36 = vsel %vm2177_vm7, %v2169_v8, %v2185_v25 }
 0x2c0   : > { %2201 = vst [vmem:[%s3831_s20 + $0x38] sm:$0xff] %v2193_v36 }
 0x2c1 PF: > { %s17_s24 = sadd.s32 1, %s3163_s24  }
 0x2c2   : > { %p14_p4 = scmp.ge.s32.totalorder %s17_s24, 4  }
 0x2c4   :  { %16 = sbr.rel (!%p14_p4) target bundleno = 1 (0x1), region = 89 }

</bundles_post_ra>
